<compile_context>
chip_gen: v6e
topology: v6e:2x2x1
jax: 0.10.0
libtpu: 0.0.40
codegen_flags: <defaults>
</compile_context>

<pallas_src>
import functools

import jax
import jax.numpy as jnp
from jax import lax
from jax.experimental import pallas as pl
from jax.experimental.pallas import tpu as pltpu


_UPCONV_ROW_TILE = 8   # pre-upsample rows per grid step (-> 16 output rows)
_HEAD_ROW_TILE = 8     # output rows per grid step for the segmentation head
_NCLS_PAD = 128        # 1x1 conv_out channels padded to a full lane width


def _pick_rows(h, target):
    """Largest row-tile <= target that divides h."""
    assert h >= 2
    for t in range(min(h, target), 1, -1):
        if h % t == 0:
            return t
    return h


# ----------------------------------------------------------------------------
# Kernel 1: fused [nearest 2x upsample -> 3x3 conv(pad=1) -> folded BN -> ReLU]
# ----------------------------------------------------------------------------
def _upconv2x_kernel(cur_ref, nxt_ref, w_ref, sc_ref, bi_ref, o_ref, tile_ref,
                     *, th, w_in, cout):
    # cur_ref/nxt_ref: (1, th, w_in+2, cin) bf16 -- row blocks i and i+1 of the
    #                  1-padded pre-upsample input (nxt supplies the 2-row halo)
    # w_ref:  (2, 2, 4*cin, cout) bf16  phase-combined weights
    # sc_ref/bi_ref: (1, cout) f32      folded-BN scale / bias
    # o_ref:  (1, 2*th, w_in, 2*cout) bf16  (free reshape in wrapper -> NHWC)
    # tile_ref: VMEM scratch (th+2, w_in+2, cin) bf16
    tile_ref[0:th, :, :] = cur_ref[0]
    tile_ref[th:th + 2, :, :] = nxt_ref[0, 0:2, :, :]

    scale = sc_ref[...]
    bias = bi_ref[...]
    m = th * w_in
    rows = []
    for py in range(2):
        cols = []
        for px in range(2):
            # im2col over the 2x2 taps of this phase: one dot with K = 4*cin,
            # accumulation happens inside the MXU.
            slabs = [tile_ref[py + a:py + a + th, px + b:px + b + w_in, :]
                     for a in range(2) for b in range(2)]
            x = jnp.concatenate(slabs, axis=-1).reshape(m, -1)
            acc = jnp.dot(x, w_ref[py, px], preferred_element_type=jnp.float32)
            cols.append(jnp.maximum(acc * scale + bias, 0.0))
        # column phases side by side on the lane dim -> one dense store later
        rows.append(jnp.concatenate(cols, axis=-1).reshape(th, w_in, 2 * cout))
    # interleave the two row phases (outer-dim merge only -> layout-trivial)
    out = jnp.stack(rows, axis=1).reshape(2 * th, w_in, 2 * cout)
    o_ref[0] = out.astype(o_ref.dtype)


def upsample2x_conv_bn_relu(x, w4, scale, bias):
    """x: (N,H,W,Cin) bf16 -> (N,2H,2W,Cout) bf16 == conv3x3(pad=1)(up2x(x))."""
    n, h, w, cin = x.shape
    cout = w4.shape[-1]
    th = _pick_rows(h, _UPCONV_ROW_TILE)
    nt = h // th
    # 1 real pad row/col (== the conv zero-pad in upsampled space) + extra zero
    # rows so the halo block i+1 always exists.
    xp = jnp.pad(x, ((0, 0), (1, th - 1), (1, 1), (0, 0)))
    out = pl.pallas_call(
        functools.partial(_upconv2x_kernel, th=th, w_in=w, cout=cout),
        out_shape=jax.ShapeDtypeStruct((n, 2 * h, w, 2 * cout), jnp.bfloat16),
        grid=(n, nt),
        in_specs=[
            pl.BlockSpec((1, th, w + 2, cin), lambda b, i: (b, i, 0, 0)),
            pl.BlockSpec((1, th, w + 2, cin), lambda b, i: (b, i + 1, 0, 0)),
            pl.BlockSpec((2, 2, 4 * cin, cout), lambda b, i: (0, 0, 0, 0)),
            pl.BlockSpec((1, cout), lambda b, i: (0, 0)),
            pl.BlockSpec((1, cout), lambda b, i: (0, 0)),
        ],
        out_specs=pl.BlockSpec((1, 2 * th, w, 2 * cout),
                               lambda b, i: (b, i, 0, 0)),
        scratch_shapes=[pltpu.VMEM((th + 2, w + 2, cin), jnp.bfloat16)],
        compiler_params=pltpu.CompilerParams(
            dimension_semantics=("parallel", "parallel")),
    )(xp, xp, w4, scale, bias)
    # (N, 2H, W, 2*Cout) -> (N, 2H, 2W, Cout): pure row-major regrouping (free)
    return out.reshape(n, 2 * h, 2 * w, cout)


# ----------------------------------------------------------------------------
# Kernel 2: SegmentationHead = 3x3 conv + BN + ReLU + 1x1 conv_out (fused)
# ----------------------------------------------------------------------------
def _seg_head_kernel(cur_ref, nxt_ref, w3_ref, sc_ref, bi_ref, w1_ref, b1_ref,
                     o_ref, tile_ref, acc_ref, *, th, w_in):
    # cur_ref/nxt_ref: (1, th, w_in+2, cin) bf16 row blocks i / i+1 of padded feats
    # w3_ref: (3, 3*cin, cmid) bf16   3x3 weights, column taps concatenated (K=3*cin)
    # sc_ref/bi_ref: (1, cmid) f32    folded BN
    # w1_ref: (cmid, 128) bf16        1x1 conv_out weights, zero-padded classes
    # b1_ref: (1, 128) f32            zero-padded bias
    # o_ref:  (1, th, w_in, 128) f32  lane-dense output
    # tile_ref: VMEM (th+2, w_in+2, cin) bf16; acc_ref: VMEM (th*w_in, cmid) f32
    tile_ref[0:th, :, :] = cur_ref[0]
    tile_ref[th:th + 2, :, :] = nxt_ref[0, 0:2, :, :]
    m = th * w_in
    for r in range(3):
        x = jnp.concatenate(
            [tile_ref[r:r + th, u:u + w_in, :] for u in range(3)],
            axis=-1).reshape(m, -1)
        contrib = jnp.dot(x, w3_ref[r], preferred_element_type=jnp.float32)
        if r == 0:
            acc_ref[...] = contrib
        else:
            acc_ref[...] += contrib
    y = jnp.maximum(acc_ref[...] * sc_ref[...] + bi_ref[...], 0.0)
    out = jnp.dot(y.astype(jnp.bfloat16), w1_ref[...],
                  preferred_element_type=jnp.float32) + b1_ref[...]
    o_ref[0] = out.reshape(th, w_in, _NCLS_PAD).astype(o_ref.dtype)


def seg_head(feats, w3c, scale, bias, w1p, b1p, n_classes):
    n, h, w, cin = feats.shape
    cmid = w3c.shape[-1]
    th = _pick_rows(h, _HEAD_ROW_TILE)
    nt = h // th
    fp = jnp.pad(feats, ((0, 0), (1, th - 1), (1, 1), (0, 0)))
    out = pl.pallas_call(
        functools.partial(_seg_head_kernel, th=th, w_in=w),
        out_shape=jax.ShapeDtypeStruct((n, h, w, _NCLS_PAD), jnp.float32),
        grid=(n, nt),
        in_specs=[
            pl.BlockSpec((1, th, w + 2, cin), lambda b, i: (b, i, 0, 0)),
            pl.BlockSpec((1, th, w + 2, cin), lambda b, i: (b, i + 1, 0, 0)),
            pl.BlockSpec((3, 3 * cin, cmid), lambda b, i: (0, 0, 0)),
            pl.BlockSpec((1, cmid), lambda b, i: (0, 0)),
            pl.BlockSpec((1, cmid), lambda b, i: (0, 0)),
            pl.BlockSpec((cmid, _NCLS_PAD), lambda b, i: (0, 0)),
            pl.BlockSpec((1, _NCLS_PAD), lambda b, i: (0, 0)),
        ],
        out_specs=pl.BlockSpec((1, th, w, _NCLS_PAD), lambda b, i: (b, i, 0, 0)),
        scratch_shapes=[
            pltpu.VMEM((th + 2, w + 2, cin), jnp.bfloat16),
            pltpu.VMEM((th * w, cmid), jnp.float32),
        ],
        compiler_params=pltpu.CompilerParams(
            dimension_semantics=("parallel", "parallel")),
    )(fp, fp, w3c, scale, bias, w1p, b1p)
    return out[..., :n_classes]


# ----------------------------------------------------------------------------
# Parameter init (ConvModule = conv(no bias) + BN(eval) + ReLU, BN folded)
# ----------------------------------------------------------------------------
def init_conv_module(key, cin, cout, k):
    k1, k2, k3, k4, k5 = jax.random.split(key, 5)
    w = jax.random.normal(k1, (cout, cin, k, k), jnp.float32) / jnp.sqrt(cin * k * k)
    gamma = 1.0 + 0.1 * jax.random.normal(k2, (cout,), jnp.float32)
    beta = 0.1 * jax.random.normal(k3, (cout,), jnp.float32)
    mean = 0.1 * jax.random.normal(k4, (cout,), jnp.float32)
    var = jnp.abs(jax.random.normal(k5, (cout,), jnp.float32)) + 1.0
    scale = gamma / jnp.sqrt(var + 1e-5)
    bias = beta - mean * scale
    w_hwio = jnp.transpose(w, (2, 3, 1, 0)).astype(jnp.bfloat16)  # (kh,kw,cin,cout)
    return w_hwio, scale.reshape(1, cout), bias.reshape(1, cout)


def init_conv_out(key, cin, cout):
    k1, k2 = jax.random.split(key)
    w = jax.random.normal(k1, (cout, cin, 1, 1), jnp.float32) / jnp.sqrt(cin)
    b = 0.1 * jax.random.normal(k2, (cout,), jnp.float32)
    w_io = jnp.transpose(w, (2, 3, 1, 0))[0, 0].astype(jnp.bfloat16)  # (cin,cout)
    return w_io, b.reshape(1, cout)


def init_sr_decoder(key, channels):
    ks = jax.random.split(key, 5)
    return {
        "conv1": init_conv_module(ks[0], channels, channels // 2, 3),
        "conv2": init_conv_module(ks[1], channels // 2, channels // 2, 3),
        "conv3": init_conv_module(ks[2], channels // 2, channels, 3),
        "sr_cbr": init_conv_module(ks[3], channels, channels // 2, 3),
        "sr_out": init_conv_out(ks[4], channels // 2, 3),
    }


# Which 3x3 taps feed each (phase, tap-offset) of the 2x-upsample decomposition.
_PHASE_TAPS = {(0, 0): (0,), (0, 1): (1, 2), (1, 0): (0, 1), (1, 1): (2,)}


def _phase_weights(w_hwio):
    """(3,3,cin,cout) -> (2,2,4*cin,cout): exact phase weights of
    [nearest-2x upsample -> 3x3 conv(pad=1)] as four 2x2 convolutions."""
    w = w_hwio.astype(jnp.float32)
    phases = []
    for py in range(2):
        row = []
        for px in range(2):
            blocks = []
            for a in range(2):
                for b in range(2):
                    acc = 0.0
                    for dy in _PHASE_TAPS[(py, a)]:
                        for dx in _PHASE_TAPS[(px, b)]:
                            acc = acc + w[dy, dx]
                    blocks.append(acc)                       # (cin, cout)
            row.append(jnp.concatenate(blocks, axis=0))      # (4*cin, cout)
        phases.append(jnp.stack(row, axis=0))
    return jnp.stack(phases, axis=0).astype(jnp.bfloat16)    # (2,2,4cin,cout)


def _head_weights(w_hwio, w1_io, b1, n_classes):
    w = w_hwio.astype(jnp.float32)
    cin, cmid = w.shape[2], w.shape[3]
    w3c = jnp.stack(
        [jnp.concatenate([w[r, u] for u in range(3)], axis=0) for r in range(3)],
        axis=0).astype(jnp.bfloat16)                         # (3, 3*cin, cmid)
    w1p = jnp.zeros((cmid, _NCLS_PAD), jnp.float32)
    w1p = w1p.at[:, :n_classes].set(w1_io.astype(jnp.float32)).astype(jnp.bfloat16)
    b1p = jnp.zeros((1, _NCLS_PAD), jnp.float32).at[:, :n_classes].set(b1)
    return w3c, w1p, b1p


def prepare_kernel_params(params, n_classes=3):
    kp = {}
    for name in ("conv1", "conv2", "conv3"):
        w, s, b = params[name]
        kp[name] = (_phase_weights(w), s, b)
    w3, s3, b3 = params["sr_cbr"]
    w1, b1 = params["sr_out"]
    kp["head"] = _head_weights(w3, w1, b1, n_classes) [:1] + \
                 (s3, b3) + _head_weights(w3, w1, b1, n_classes)[1:]
    kp["n_classes"] = n_classes
    return kp


# ----------------------------------------------------------------------------
# SRDecoder forward (Pallas)
# ----------------------------------------------------------------------------
def sr_decoder_forward(x_nhwc, kparams, up_lists=(2, 2, 2), fa=False):
    # TODO(synk): only scale_factor == 2 (the module default) is implemented;
    # other factors would need their own phase decomposition.
    assert tuple(up_lists) == (2, 2, 2)
    x = x_nhwc.astype(jnp.bfloat16)
    x = upsample2x_conv_bn_relu(x, *kparams["conv1"])
    x = upsample2x_conv_bn_relu(x, *kparams["conv2"])
    feats = upsample2x_conv_bn_relu(x, *kparams["conv3"])
    outs = seg_head(feats, *kparams["head"], n_classes=kparams["n_classes"])
    return (feats, outs) if fa else outs


# ----------------------------------------------------------------------------
# Pure-JAX reference (straightforward upsample -> conv -> BN -> ReLU pipeline)
# ----------------------------------------------------------------------------
def _upsample_nearest(x, s):
    return jnp.repeat(jnp.repeat(x, s, axis=1), s, axis=2)


def _ref_conv(x, w_hwio, scale, bias, relu, pad):
    y = lax.conv_general_dilated(
        x.astype(jnp.float32), w_hwio.astype(jnp.float32), (1, 1),
        [(pad, pad), (pad, pad)],
        dimension_numbers=("NHWC", "HWIO", "NHWC"))
    y = y * scale.reshape(1, 1, 1, -1) + bias.reshape(1, 1, 1, -1)
    return jnp.maximum(y, 0.0) if relu else y


def sr_decoder_ref(x_nhwc, params):
    x = x_nhwc.astype(jnp.bfloat16)

    def cm(x_, p):  # ConvModule with bf16 activation storage (matches kernels)
        return _ref_conv(x_, p[0], p[1], p[2], True, 1).astype(jnp.bfloat16)

    x = cm(_upsample_nearest(x, 2), params["conv1"])
    x = cm(_upsample_nearest(x, 2), params["conv2"])
    feats = cm(_upsample_nearest(x, 2), params["conv3"])
    y = cm(feats, params["sr_cbr"])
    w1, b1 = params["sr_out"]
    out = jnp.dot(y.astype(jnp.float32).reshape(-1, y.shape[-1]),
                  w1.astype(jnp.float32)) + b1
    return out.reshape(y.shape[:-1] + (b1.shape[-1],))


if __name__ == "__main__":
    key = jax.random.PRNGKey(0)
    k_in, k_par = jax.random.split(key)

    # Small shapes consistent with the module: batch=2, channels=8, 16x16 input.
    N, C, H, W = 2, 8, 16, 16
    x_nchw = jax.random.normal(k_in, (N, C, H, W), jnp.float32)
    x_nhwc = jnp.transpose(x_nchw, (0, 2, 3, 1))

    params = init_sr_decoder(k_par, C)
    kparams = prepare_kernel_params(params, n_classes=3)

    outs = jax.block_until_ready(sr_decoder_forward(x_nhwc, kparams))
    assert outs.shape == (N, 8 * H, 8 * W, 3), outs.shape

    ref = jax.block_until_ready(sr_decoder_ref(x_nhwc, params))
    max_err = float(jnp.max(jnp.abs(outs - ref)))
    assert jnp.allclose(outs, ref, atol=3e-2, rtol=3e-2), f"max abs err {max_err}"

    print("KERNEL_OK")
</pallas_src>

<mosaic_0001>
module attributes {stable_mosaic.version = 11 : i64} {
  func.func @_upconv2x_kernel(%arg0: i32, %arg1: i32, %arg2: memref<1x8x18x8xbf16, #tpu.memory_space<vmem>>, %arg3: memref<1x8x18x8xbf16, #tpu.memory_space<vmem>>, %arg4: memref<2x2x32x4xbf16, #tpu.memory_space<vmem>>, %arg5: memref<1x4xf32, #tpu.memory_space<vmem>>, %arg6: memref<1x4xf32, #tpu.memory_space<vmem>>, %arg7: memref<1x16x16x8xbf16, #tpu.memory_space<vmem>>, %arg8: memref<10x18x8xbf16, #tpu.memory_space<vmem>>) attributes {dimension_semantics = [#tpu.dimension_semantics<parallel>, #tpu.dimension_semantics<parallel>], iteration_bounds = array<i64: 2, 2>, scalar_prefetch = 0 : i64, scratch_operands = 1 : i64, tpu.core_type = #tpu.core_type<tc>, window_params = [{transform_indices = @transform_0, window_bounds = array<i64: 1, 8, 18, 8>}, {transform_indices = @transform_1, window_bounds = array<i64: 1, 8, 18, 8>}, {pipeline_mode = #tpu.pipeline_mode<synchronous>, transform_indices = @transform_2, window_bounds = array<i64: 2, 2, 32, 4>}, {pipeline_mode = #tpu.pipeline_mode<synchronous>, transform_indices = @transform_3, window_bounds = array<i64: 1, 4>}, {pipeline_mode = #tpu.pipeline_mode<synchronous>, transform_indices = @transform_4, window_bounds = array<i64: 1, 4>}, {transform_indices = @transform_5, window_bounds = array<i64: 1, 16, 16, 8>}]} {
    %c0 = arith.constant 0 : index
    %c0_0 = arith.constant 0 : index
    %c0_1 = arith.constant 0 : index
    %c0_2 = arith.constant 0 : index
    %0 = vector.load %arg2[%c0, %c0_0, %c0_1, %c0_2] : memref<1x8x18x8xbf16, #tpu.memory_space<vmem>>, vector<1x8x18x8xbf16>
    %1 = vector.shape_cast %0 : vector<1x8x18x8xbf16> to vector<8x18x8xbf16>
    %c0_3 = arith.constant 0 : index
    %c0_4 = arith.constant 0 : index
    %c0_5 = arith.constant 0 : index
    %2 = vector.load %arg8[%c0_3, %c0_4, %c0_5] : memref<10x18x8xbf16, #tpu.memory_space<vmem>>, vector<8x18x8xbf16>
    tpu.vector_store %arg8[%c0_3, %c0_4, %c0_5], %1 {strides = array<i32>} : memref<10x18x8xbf16, #tpu.memory_space<vmem>>, vector<8x18x8xbf16>,
    %c0_6 = arith.constant 0 : index
    %c0_7 = arith.constant 0 : index
    %c0_8 = arith.constant 0 : index
    %c0_9 = arith.constant 0 : index
    %3 = vector.load %arg3[%c0_6, %c0_7, %c0_8, %c0_9] : memref<1x8x18x8xbf16, #tpu.memory_space<vmem>>, vector<1x2x18x8xbf16>
    %4 = vector.shape_cast %3 : vector<1x2x18x8xbf16> to vector<2x18x8xbf16>
    %c8 = arith.constant 8 : index
    %c0_10 = arith.constant 0 : index
    %c0_11 = arith.constant 0 : index
    %5 = vector.load %arg8[%c8, %c0_10, %c0_11] : memref<10x18x8xbf16, #tpu.memory_space<vmem>>, vector<2x18x8xbf16>
    tpu.vector_store %arg8[%c8, %c0_10, %c0_11], %4 {strides = array<i32>} : memref<10x18x8xbf16, #tpu.memory_space<vmem>>, vector<2x18x8xbf16>,
    %c0_12 = arith.constant 0 : index
    %c0_13 = arith.constant 0 : index
    %6 = vector.load %arg5[%c0_12, %c0_13] : memref<1x4xf32, #tpu.memory_space<vmem>>, vector<1x4xf32>
    %c0_14 = arith.constant 0 : index
    %c0_15 = arith.constant 0 : index
    %7 = vector.load %arg6[%c0_14, %c0_15] : memref<1x4xf32, #tpu.memory_space<vmem>>, vector<1x4xf32>
    %c0_16 = arith.constant 0 : index
    %c0_17 = arith.constant 0 : index
    %c0_18 = arith.constant 0 : index
    %8 = vector.load %arg8[%c0_16, %c0_17, %c0_18] : memref<10x18x8xbf16, #tpu.memory_space<vmem>>, vector<8x16x8xbf16>
    %c0_19 = arith.constant 0 : index
    %c1 = arith.constant 1 : index
    %c0_20 = arith.constant 0 : index
    %9 = vector.load %arg8[%c0_19, %c1, %c0_20] : memref<10x18x8xbf16, #tpu.memory_space<vmem>>, vector<8x16x8xbf16>
    %c1_21 = arith.constant 1 : index
    %c0_22 = arith.constant 0 : index
    %c0_23 = arith.constant 0 : index
    %10 = vector.load %arg8[%c1_21, %c0_22, %c0_23] : memref<10x18x8xbf16, #tpu.memory_space<vmem>>, vector<8x16x8xbf16>
    %c1_24 = arith.constant 1 : index
    %c1_25 = arith.constant 1 : index
    %c0_26 = arith.constant 0 : index
    %11 = vector.load %arg8[%c1_24, %c1_25, %c0_26] : memref<10x18x8xbf16, #tpu.memory_space<vmem>>, vector<8x16x8xbf16>
    %12 = tpu.concatenate %8, %9, %10, %11 in 2 : vector<8x16x8xbf16>, vector<8x16x8xbf16>, vector<8x16x8xbf16>, vector<8x16x8xbf16> -> vector<8x16x32xbf16>
    %13 = vector.shape_cast %12 : vector<8x16x32xbf16> to vector<128x32xbf16>
    %c0_27 = arith.constant 0 : index
    %c0_28 = arith.constant 0 : index
    %c0_29 = arith.constant 0 : index
    %c0_30 = arith.constant 0 : index
    %14 = vector.load %arg4[%c0_27, %c0_28, %c0_29, %c0_30] : memref<2x2x32x4xbf16, #tpu.memory_space<vmem>>, vector<1x1x32x4xbf16>
    %15 = vector.shape_cast %14 : vector<1x1x32x4xbf16> to vector<32x4xbf16>
    %cst = arith.constant dense<0.000000e+00> : vector<128x4xf32>
    %16 = tpu.matmul %13, %15, %cst {dimension_numbers = #tpu.dot_dimension_numbers<[1], [0], [0], [1], [0, 0, 1, 1], [], []>} : vector<128x32xbf16>, vector<32x4xbf16>, vector<128x4xf32> -> vector<128x4xf32>
    %17 = vector.broadcast %6 : vector<1x4xf32> to vector<128x4xf32>
    %18 = arith.mulf %16, %17 : vector<128x4xf32>
    %19 = vector.broadcast %7 : vector<1x4xf32> to vector<128x4xf32>
    %20 = arith.addf %18, %19 : vector<128x4xf32>
    %cst_31 = arith.constant 0.000000e+00 : f32
    %21 = vector.broadcast %cst_31 : f32 to vector<128x4xf32>
    %22 = arith.maximumf %20, %21 : vector<128x4xf32>
    %c0_32 = arith.constant 0 : index
    %c1_33 = arith.constant 1 : index
    %c0_34 = arith.constant 0 : index
    %23 = vector.load %arg8[%c0_32, %c1_33, %c0_34] : memref<10x18x8xbf16, #tpu.memory_space<vmem>>, vector<8x16x8xbf16>
    %c0_35 = arith.constant 0 : index
    %c2 = arith.constant 2 : index
    %c0_36 = arith.constant 0 : index
    %24 = vector.load %arg8[%c0_35, %c2, %c0_36] : memref<10x18x8xbf16, #tpu.memory_space<vmem>>, vector<8x16x8xbf16>
    %c1_37 = arith.constant 1 : index
    %c1_38 = arith.constant 1 : index
    %c0_39 = arith.constant 0 : index
    %25 = vector.load %arg8[%c1_37, %c1_38, %c0_39] : memref<10x18x8xbf16, #tpu.memory_space<vmem>>, vector<8x16x8xbf16>
    %c1_40 = arith.constant 1 : index
    %c2_41 = arith.constant 2 : index
    %c0_42 = arith.constant 0 : index
    %26 = vector.load %arg8[%c1_40, %c2_41, %c0_42] : memref<10x18x8xbf16, #tpu.memory_space<vmem>>, vector<8x16x8xbf16>
    %27 = tpu.concatenate %23, %24, %25, %26 in 2 : vector<8x16x8xbf16>, vector<8x16x8xbf16>, vector<8x16x8xbf16>, vector<8x16x8xbf16> -> vector<8x16x32xbf16>
    %28 = vector.shape_cast %27 : vector<8x16x32xbf16> to vector<128x32xbf16>
    %c0_43 = arith.constant 0 : index
    %c1_44 = arith.constant 1 : index
    %c0_45 = arith.constant 0 : index
    %c0_46 = arith.constant 0 : index
    %29 = vector.load %arg4[%c0_43, %c1_44, %c0_45, %c0_46] : memref<2x2x32x4xbf16, #tpu.memory_space<vmem>>, vector<1x1x32x4xbf16>
    %30 = vector.shape_cast %29 : vector<1x1x32x4xbf16> to vector<32x4xbf16>
    %cst_47 = arith.constant dense<0.000000e+00> : vector<128x4xf32>
    %31 = tpu.matmul %28, %30, %cst_47 {dimension_numbers = #tpu.dot_dimension_numbers<[1], [0], [0], [1], [0, 0, 1, 1], [], []>} : vector<128x32xbf16>, vector<32x4xbf16>, vector<128x4xf32> -> vector<128x4xf32>
    %32 = vector.broadcast %6 : vector<1x4xf32> to vector<128x4xf32>
    %33 = arith.mulf %31, %32 : vector<128x4xf32>
    %34 = vector.broadcast %7 : vector<1x4xf32> to vector<128x4xf32>
    %35 = arith.addf %33, %34 : vector<128x4xf32>
    %cst_48 = arith.constant 0.000000e+00 : f32
    %36 = vector.broadcast %cst_48 : f32 to vector<128x4xf32>
    %37 = arith.maximumf %35, %36 : vector<128x4xf32>
    %38 = tpu.concatenate %22, %37 in 1 : vector<128x4xf32>, vector<128x4xf32> -> vector<128x8xf32>
    %39 = vector.shape_cast %38 : vector<128x8xf32> to vector<8x16x8xf32>
    %c1_49 = arith.constant 1 : index
    %c0_50 = arith.constant 0 : index
    %c0_51 = arith.constant 0 : index
    %40 = vector.load %arg8[%c1_49, %c0_50, %c0_51] : memref<10x18x8xbf16, #tpu.memory_space<vmem>>, vector<8x16x8xbf16>
    %c1_52 = arith.constant 1 : index
    %c1_53 = arith.constant 1 : index
    %c0_54 = arith.constant 0 : index
    %41 = vector.load %arg8[%c1_52, %c1_53, %c0_54] : memref<10x18x8xbf16, #tpu.memory_space<vmem>>, vector<8x16x8xbf16>
    %c2_55 = arith.constant 2 : index
    %c0_56 = arith.constant 0 : index
    %c0_57 = arith.constant 0 : index
    %42 = vector.load %arg8[%c2_55, %c0_56, %c0_57] : memref<10x18x8xbf16, #tpu.memory_space<vmem>>, vector<8x16x8xbf16>
    %c2_58 = arith.constant 2 : index
    %c1_59 = arith.constant 1 : index
    %c0_60 = arith.constant 0 : index
    %43 = vector.load %arg8[%c2_58, %c1_59, %c0_60] : memref<10x18x8xbf16, #tpu.memory_space<vmem>>, vector<8x16x8xbf16>
    %44 = tpu.concatenate %40, %41, %42, %43 in 2 : vector<8x16x8xbf16>, vector<8x16x8xbf16>, vector<8x16x8xbf16>, vector<8x16x8xbf16> -> vector<8x16x32xbf16>
    %45 = vector.shape_cast %44 : vector<8x16x32xbf16> to vector<128x32xbf16>
    %c1_61 = arith.constant 1 : index
    %c0_62 = arith.constant 0 : index
    %c0_63 = arith.constant 0 : index
    %c0_64 = arith.constant 0 : index
    %46 = vector.load %arg4[%c1_61, %c0_62, %c0_63, %c0_64] : memref<2x2x32x4xbf16, #tpu.memory_space<vmem>>, vector<1x1x32x4xbf16>
    %47 = vector.shape_cast %46 : vector<1x1x32x4xbf16> to vector<32x4xbf16>
    %cst_65 = arith.constant dense<0.000000e+00> : vector<128x4xf32>
    %48 = tpu.matmul %45, %47, %cst_65 {dimension_numbers = #tpu.dot_dimension_numbers<[1], [0], [0], [1], [0, 0, 1, 1], [], []>} : vector<128x32xbf16>, vector<32x4xbf16>, vector<128x4xf32> -> vector<128x4xf32>
    %49 = vector.broadcast %6 : vector<1x4xf32> to vector<128x4xf32>
    %50 = arith.mulf %48, %49 : vector<128x4xf32>
    %51 = vector.broadcast %7 : vector<1x4xf32> to vector<128x4xf32>
    %52 = arith.addf %50, %51 : vector<128x4xf32>
    %cst_66 = arith.constant 0.000000e+00 : f32
    %53 = vector.broadcast %cst_66 : f32 to vector<128x4xf32>
    %54 = arith.maximumf %52, %53 : vector<128x4xf32>
    %c1_67 = arith.constant 1 : index
    %c1_68 = arith.constant 1 : index
    %c0_69 = arith.constant 0 : index
    %55 = vector.load %arg8[%c1_67, %c1_68, %c0_69] : memref<10x18x8xbf16, #tpu.memory_space<vmem>>, vector<8x16x8xbf16>
    %c1_70 = arith.constant 1 : index
    %c2_71 = arith.constant 2 : index
    %c0_72 = arith.constant 0 : index
    %56 = vector.load %arg8[%c1_70, %c2_71, %c0_72] : memref<10x18x8xbf16, #tpu.memory_space<vmem>>, vector<8x16x8xbf16>
    %c2_73 = arith.constant 2 : index
    %c1_74 = arith.constant 1 : index
    %c0_75 = arith.constant 0 : index
    %57 = vector.load %arg8[%c2_73, %c1_74, %c0_75] : memref<10x18x8xbf16, #tpu.memory_space<vmem>>, vector<8x16x8xbf16>
    %c2_76 = arith.constant 2 : index
    %c2_77 = arith.constant 2 : index
    %c0_78 = arith.constant 0 : index
    %58 = vector.load %arg8[%c2_76, %c2_77, %c0_78] : memref<10x18x8xbf16, #tpu.memory_space<vmem>>, vector<8x16x8xbf16>
    %59 = tpu.concatenate %55, %56, %57, %58 in 2 : vector<8x16x8xbf16>, vector<8x16x8xbf16>, vector<8x16x8xbf16>, vector<8x16x8xbf16> -> vector<8x16x32xbf16>
    %60 = vector.shape_cast %59 : vector<8x16x32xbf16> to vector<128x32xbf16>
    %c1_79 = arith.constant 1 : index
    %c1_80 = arith.constant 1 : index
    %c0_81 = arith.constant 0 : index
    %c0_82 = arith.constant 0 : index
    %61 = vector.load %arg4[%c1_79, %c1_80, %c0_81, %c0_82] : memref<2x2x32x4xbf16, #tpu.memory_space<vmem>>, vector<1x1x32x4xbf16>
    %62 = vector.shape_cast %61 : vector<1x1x32x4xbf16> to vector<32x4xbf16>
    %cst_83 = arith.constant dense<0.000000e+00> : vector<128x4xf32>
    %63 = tpu.matmul %60, %62, %cst_83 {dimension_numbers = #tpu.dot_dimension_numbers<[1], [0], [0], [1], [0, 0, 1, 1], [], []>} : vector<128x32xbf16>, vector<32x4xbf16>, vector<128x4xf32> -> vector<128x4xf32>
    %64 = vector.broadcast %6 : vector<1x4xf32> to vector<128x4xf32>
    %65 = arith.mulf %63, %64 : vector<128x4xf32>
    %66 = vector.broadcast %7 : vector<1x4xf32> to vector<128x4xf32>
    %67 = arith.addf %65, %66 : vector<128x4xf32>
    %cst_84 = arith.constant 0.000000e+00 : f32
    %68 = vector.broadcast %cst_84 : f32 to vector<128x4xf32>
    %69 = arith.maximumf %67, %68 : vector<128x4xf32>
    %70 = tpu.concatenate %54, %69 in 1 : vector<128x4xf32>, vector<128x4xf32> -> vector<128x8xf32>
    %71 = vector.shape_cast %70 : vector<128x8xf32> to vector<8x16x8xf32>
    %72 = vector.shape_cast %39 : vector<8x16x8xf32> to vector<8x1x16x8xf32>
    %73 = vector.shape_cast %71 : vector<8x16x8xf32> to vector<8x1x16x8xf32>
    %74 = tpu.concatenate %72, %73 in 1 : vector<8x1x16x8xf32>, vector<8x1x16x8xf32> -> vector<8x2x16x8xf32>
    %75 = vector.shape_cast %74 : vector<8x2x16x8xf32> to vector<16x16x8xf32>
    %76 = arith.truncf %75 : vector<16x16x8xf32> to vector<16x16x8xbf16>
    %c0_85 = arith.constant 0 : index
    %c0_86 = arith.constant 0 : index
    %c0_87 = arith.constant 0 : index
    %c0_88 = arith.constant 0 : index
    %77 = vector.load %arg7[%c0_85, %c0_86, %c0_87, %c0_88] : memref<1x16x16x8xbf16, #tpu.memory_space<vmem>>, vector<1x16x16x8xbf16>
    %78 = vector.shape_cast %77 : vector<1x16x16x8xbf16> to vector<16x16x8xbf16>
    %79 = vector.shape_cast %76 : vector<16x16x8xbf16> to vector<1x16x16x8xbf16>
    tpu.vector_store %arg7[%c0_85, %c0_86, %c0_87, %c0_88], %79 {strides = array<i32>} : memref<1x16x16x8xbf16, #tpu.memory_space<vmem>>, vector<1x16x16x8xbf16>,
    return
  }
  func.func @transform_0(%arg0: i32, %arg1: i32) -> (i32, i32, i32, i32) {
    %c0_i32 = arith.constant 0 : i32
    %c0_i32_0 = arith.constant 0 : i32
    %c0_i32_1 = arith.constant 0 : i32
    return %arg0, %arg1, %c0_i32, %c0_i32_0 : i32, i32, i32, i32
  }
  func.func @transform_1(%arg0: i32, %arg1: i32) -> (i32, i32, i32, i32) {
    %c1_i32 = arith.constant 1 : i32
    %0 = arith.addi %arg1, %c1_i32 : i32
    %c0_i32 = arith.constant 0 : i32
    %c0_i32_0 = arith.constant 0 : i32
    %c0_i32_1 = arith.constant 0 : i32
    return %arg0, %0, %c0_i32, %c0_i32_0 : i32, i32, i32, i32
  }
  func.func @transform_2(%arg0: i32, %arg1: i32) -> (i32, i32, i32, i32) {
    %c0_i32 = arith.constant 0 : i32
    %c0_i32_0 = arith.constant 0 : i32
    %c0_i32_1 = arith.constant 0 : i32
    %c0_i32_2 = arith.constant 0 : i32
    %c0_i32_3 = arith.constant 0 : i32
    return %c0_i32, %c0_i32_0, %c0_i32_1, %c0_i32_2 : i32, i32, i32, i32
  }
  func.func @transform_3(%arg0: i32, %arg1: i32) -> (i32, i32) {
    %c0_i32 = arith.constant 0 : i32
    %c0_i32_0 = arith.constant 0 : i32
    %c0_i32_1 = arith.constant 0 : i32
    return %c0_i32, %c0_i32_0 : i32, i32
  }
  func.func @transform_4(%arg0: i32, %arg1: i32) -> (i32, i32) {
    %c0_i32 = arith.constant 0 : i32
    %c0_i32_0 = arith.constant 0 : i32
    %c0_i32_1 = arith.constant 0 : i32
    return %c0_i32, %c0_i32_0 : i32, i32
  }
  func.func @transform_5(%arg0: i32, %arg1: i32) -> (i32, i32, i32, i32) {
    %c0_i32 = arith.constant 0 : i32
    %c0_i32_0 = arith.constant 0 : i32
    %c0_i32_1 = arith.constant 0 : i32
    return %arg0, %arg1, %c0_i32, %c0_i32_0 : i32, i32, i32, i32
  }
}

</mosaic_0001>

<bundles_post_ra>
// kernel: tpu_custom_call.1
= control target key start
LH: loop header
LB: loop body
LE: loop exit
PB: predicated region body
PF: predicated region fallthrough
CT: control target
= control target key end

     0   :  { %s3744_s18 = smov 0   ;;  %s3746_s19 = smov 0   ;;  %s5069_s0 = inlined_call_operand.vmem [shape: bf16[2,24,18,8], index: 0, kind: input, shape index: {}]   ;;  %s5070_s1 = inlined_call_operand.vmem [shape: bf16[2,24,18,8], index: 1, kind: input, shape index: {}]   ;;  %s5071_s2 = inlined_call_operand.vmem [shape: bf16[2,2,32,4], index: 2, kind: input, shape index: {}]   ;;  %s5072_s3 = inlined_call_operand.vmem [shape: f32[1,4], index: 3, kind: input, shape index: {}]   ;;  %s5073_s4 = inlined_call_operand.vmem [shape: f32[1,4], index: 4, kind: input, shape index: {}]   ;;  %s5074_s5 = inlined_call_operand.vmem [shape: bf16[2,32,16,8], index: 5, kind: output, shape index: {}]  }
   0x1   :  { %s3748_s20 = smov 0   ;;  %s3750_s21 = smov 0  }
   0x2   :  { %s3752_s22 = smov 0  }
   0x3 LB: > { %s24_s23 = sadd.s32 1, %s3700_s20  ;;  %s27_s24 = sadd.s32 1, %s3704_s21  ;;  %s3708_s22 = sphi %s3752_s22, %s15_s22   ;;  %s3704_s21 = sphi %s3750_s21, %s5184_s21   ;;  %s3700_s20 = sphi %s3748_s20, %s5183_s20   ;;  %s3696_s19 = sphi %s3746_s19, %s5182_s19   ;;  %s3692_s18 = sphi %s3744_s18, %s5181_s18  }
   0x4   : > { %p25_p0 = scmp.ge.s32.totalorder %s24_s23, 2  ;;  %p3148_p1 = scmp.ge.s32.totalorder %s3708_s22, 1 }
   0x5   : > { %p231_p2 = scmp.lt.s32.totalorder %s3708_s22, 5 }
   0x6   : > { %s5186_s23 = smov (%p25_p0, %s24_s23), 0  ;;  %s5188_s24 = smov (!%p25_p0, %s27_s24), %s3704_s21 }
   0x7   : > { %p232_p3 = pnand %p3148_p1, %p231_p2  ;;  %p29_p4 = scmp.ge.s32.totalorder %s5188_s24, 2 }
   0x9   : > { %s5190_s24 = smov (%p29_p4, %s5188_s24), 0  ;;  %235 = sbr.rel (%p232_p3) target bundleno = 680 (0x2a8), region = 40 }
   0xe   : > { %s3777_s25 = sshll.u32 %s3692_s18, 3  ;;  %p281_p5 = scmp.lt.s32.totalorder %s3696_s19, 1  ;;  %vm340_vm0 = vcmask 60416   ;;  %vm343_vm1 = vcmask 57344   ;;  %vm494_vm2 = vsmask.f32 7424 }
   0xf   : > { %p283_p6 = scmp.lt.s32.totalorder %s3777_s25, 23  ;;  %s3710_s9 = smov 16   ;;  %vm799_vm3 = vcmask 64512   ;;  %vm816_vm4 = vcmask 130048   ;;  %vm833_vm5 = vcmask 195584   ;;  %vm866_vm6 = vcmask 261120  }
  0x10   : > { %s5192_s19 = smov (!%p281_p5, %s3696_s19), 1  ;;  %s3711_s10 = smov 8   ;;  %vm1762_vm7 = vcmask 31744  }
  0x11   : > { %s284_s26 = scalar_select %p283_p6, %s3777_s25, 23 }
  0x12   : > { %s3472_s27 = smul.u32 72, %s5192_s19  ;;  %s3318_s11 = sadd.s32 8, %s3777_s25 }
  0x13   : > { %s3471_s28 = smul.u32 3, %s284_s26  ;;  %p3880_p7 = scmp.lt.s32.totalorder %s3318_s11, 23 }
  0x14   : > { %s3712_s13 = smov 24   ;;  %s3155_s7 = sshll.u32 %s5192_s19, 6 }
  0x15   : > { %s287_s29 = sadd.s32 %s3472_s27, %s3471_s28  ;;  %s5194_s11 = smov (!%p3880_p7, %s3318_s11), 23 }
  0x16   : > { %s3150_s30 = sshll.u32 %s287_s29, 2  ;;  %s3473_s16 = smul.u32 3, %s5194_s11 }
  0x17   : > { %s3789_s8 = scalar_lea.vmem %s5069_s0, %s3150_s30  ;;  %s3713_s29 = smov 4  }
  0x18   : > { %v322_v0 = vld [vmem:[%s3789_s8 + $0x18] sm:$0xf]  ;;  %v323_v1 = vld [vmem:[%s3789_s8 + $0x1c] sm:$0xf]  ;;  %v319_v2 = vld [vmem:[%s3789_s8 + $0xc] sm:$0xf]  ;;  %s299_s26 = sadd.s32 %s3473_s16, %s3472_s27 }
  0x19   : > { %348 = vst.msk [vmem:[#allocation2 + $0x18] sm:$0xf] %vm340_vm0, %v322_v0  ;;  %349 = vst.msk [vmem:[#allocation2 + $0x1c] sm:$0xf] %vm340_vm0, %v323_v1  ;;  %v320_v3 = vld [vmem:[%s3789_s8 + $0x10] sm:$0xf] }
  0x1a   : > { %v321_v4 = vld [vmem:[%s3789_s8 + $0x14] sm:$0x1]  ;;  %345 = vst.msk [vmem:[#allocation2 + $0xc] sm:$0xf] %vm340_vm0, %v319_v2  ;;  %346 = vst.msk [vmem:[#allocation2 + $0x10] sm:$0xf] %vm340_vm0, %v320_v3 }
  0x1b   : > { %347 = vst.msk [vmem:[#allocation2 + $0x14] sm:$0x1] %vm343_vm1, %v321_v4  ;;  %v318_v5 = vld [vmem:[%s3789_s8 + $0x8] sm:$0x1]  ;;  %v324_v6 = vld [vmem:[%s3789_s8 + $0x20] sm:$0x1] }
  0x1c   : > { %v325_v7 = vld [vmem:[%s3789_s8 + $0x24] sm:$0xf]  ;;  %344 = vst.msk [vmem:[#allocation2 + $0x8] sm:$0x1] %vm343_vm1, %v318_v5  ;;  %350 = vst.msk [vmem:[#allocation2 + $0x20] sm:$0x1] %vm343_vm1, %v324_v6 }
  0x1d   : > { %v326_v8 = vld [vmem:[%s3789_s8 + $0x28] sm:$0xf]  ;;  %351 = vst.msk [vmem:[#allocation2 + $0x24] sm:$0xf] %vm340_vm0, %v325_v7  ;;  %v316_v9 = vld [vmem:[%s3789_s8] sm:$0xf] }
  0x1e   : > { %352 = vst.msk [vmem:[#allocation2 + $0x28] sm:$0xf] %vm340_vm0, %v326_v8  ;;  %v317_v10 = vld [vmem:[%s3789_s8 + $0x4] sm:$0xf]  ;;  %341 = vst.msk [vmem:[#allocation2] sm:$0xf] %vm340_vm0, %v316_v9 }
  0x1f   : > { %v328_v11 = vld [vmem:[%s3789_s8 + $0x30] sm:$0xf]  ;;  %v329_v12 = vld [vmem:[%s3789_s8 + $0x34] sm:$0xf]  ;;  %342 = vst.msk [vmem:[#allocation2 + $0x4] sm:$0xf] %vm340_vm0, %v317_v10 }
  0x20   : > { %354 = vst.msk [vmem:[#allocation2 + $0x30] sm:$0xf] %vm340_vm0, %v328_v11  ;;  %355 = vst.msk [vmem:[#allocation2 + $0x34] sm:$0xf] %vm340_vm0, %v329_v12  ;;  %v327_v13 = vld [vmem:[%s3789_s8 + $0x2c] sm:$0x1] }
  0x21   : > { %v330_v14 = vld [vmem:[%s3789_s8 + $0x38] sm:$0x1]  ;;  %v331_v15 = vld [vmem:[%s3789_s8 + $0x3c] sm:$0xf]  ;;  %353 = vst.msk [vmem:[#allocation2 + $0x2c] sm:$0x1] %vm343_vm1, %v327_v13 }
  0x22   : > { %356 = vst.msk [vmem:[#allocation2 + $0x38] sm:$0x1] %vm343_vm1, %v330_v14  ;;  %v332_v16 = vld [vmem:[%s3789_s8 + $0x40] sm:$0xf]  ;;  %v334_v17 = vld [vmem:[%s3789_s8 + $0x48] sm:$0xf] }
  0x23   : > { %357 = vst.msk [vmem:[#allocation2 + $0x3c] sm:$0xf] %vm340_vm0, %v331_v15  ;;  %v335_v18 = vld [vmem:[%s3789_s8 + $0x4c] sm:$0xf]  ;;  %358 = vst.msk [vmem:[#allocation2 + $0x40] sm:$0xf] %vm340_vm0, %v332_v16 }
  0x24   : > { %360 = vst.msk [vmem:[#allocation2 + $0x48] sm:$0xf] %vm340_vm0, %v334_v17  ;;  %361 = vst.msk [vmem:[#allocation2 + $0x4c] sm:$0xf] %vm340_vm0, %v335_v18  ;;  %v333_v19 = vld [vmem:[%s3789_s8 + $0x44] sm:$0x1] }
  0x25   : > { %v336_v20 = vld [vmem:[%s3789_s8 + $0x50] sm:$0x1]  ;;  %v337_v21 = vld [vmem:[%s3789_s8 + $0x54] sm:$0xf]  ;;  %v408_v22 = vld [vmem:[#allocation2 + $0x18] sm:$0xf] }
  0x26   : > { %v409_v23 = vld [vmem:[#allocation2 + $0x1c] sm:$0xf]  ;;  %v1049_v24 = vld [vmem:[#allocation2 + $0x18] sm:$0xe]  ;;  %359 = vst.msk [vmem:[#allocation2 + $0x44] sm:$0x1] %vm343_vm1, %v333_v19 }
  0x27   : > { %362 = vst.msk [vmem:[#allocation2 + $0x50] sm:$0x1] %vm343_vm1, %v336_v20  ;;  %v3835_v25 = vcombine.low %v408_v22, %v409_v23  ;;  %v406_v26 = vld [vmem:[#allocation2 + $0xc] sm:$0xf]  ;;  %v407_v27 = vld [vmem:[#allocation2 + $0x10] sm:$0xf]  ;;  %v3210_v31 = vcombine.low %v1049_v24, %v409_v23 }
  0x28   : > { %363 = vst.msk [vmem:[#allocation2 + $0x54] sm:$0xf] %vm340_vm0, %v337_v21  ;;  %v3837_v28 = vcombine.low %v406_v26, %v407_v27  ;;  %v3839_v29 = vld [vmem:[#allocation2 + $0x14] ss:$0 sps:$4 sm:$0x11]   ;;  %s3152_s27 = sshll.u32 %s299_s26, 2 }
  0x29   : > { %649 = vrot.lane.b32.xlu1 %v3835_v25, %s3710_s9  ;;  %v3843_v30 = vld [vmem:[#allocation2 + $0x8] ss:$0 sps:$4 sm:$0x11]   ;;  %v3848_v33 = vld [vmem:[#allocation2 + $0x14] ss:$0 sps:$4 sm:$0x11]   ;;  %s3976_s30 = scalar_lea.vmem %s5070_s1, %s3152_s27 }
  0x2a   : > { %647 = vrot.lane.b32.xlu0 %v3837_v28, %s3710_s9  ;;  %v1088_v32 = vshrl.u32 %v3843_v30, 16  ;;  %v3850_v34 = vld [vmem:[#allocation2 + $0x20] ss:$0 sps:$4 sm:$0x11]   ;;  %v3852_v35 = vld [vmem:[#allocation2 + $0x4] sm:$0xf] }
  0x2b   : > { %v410_v36 = vld [vmem:[#allocation2 + $0x24] sm:$0xf]  ;;  %v1040_v37 = vld [vmem:[#allocation2] sm:$0xe]  ;;  %v1098_v38 = vshrl.u32 %v3848_v33, 16  ;;  %v1245_v41 = vshll.u32 %v3210_v31, 16 }
  0x2c   : > { %v411_v39 = vld [vmem:[#allocation2 + $0x28] sm:$0xf]  ;;  %v3201_v40 = vcombine.low %v1040_v37, %v3852_v35  ;;  %v3859_v42 = vld [vmem:[#allocation2 + $0x10] sm:$0xf]  ;;  %v503_v43 = vshll.u32 %v3843_v30, 16  ;;  %v1243_v44 = vshrl.u32 %v3210_v31, 16 }
  0x2d   : > { %1192 = vrot.lane.b32.xlu1 %v3839_v29, %s3710_s9  ;;  %v1041_v45 = vld [vmem:[#allocation2 + $0xc] sm:$0xe]  ;;  %v3864_v49 = vld [vmem:[#allocation2 + $0x1c] sm:$0xf]  ;;  %v3868_v50 = vcombine.low %v410_v36, %v411_v39  ;;  %v5078_v51 = vshrl.u32 %v3839_v29, 16  ;;  %v707_v55 = vshll.u32 %v3850_v34, 16 }
  0x2e   : > { %1162 = vrot.lane.b32.xlu0 %v1088_v32, %s3711_s10  ;;  %v1081_v46 = vshrl.u32 %v3201_v40, 16  ;;  %v1083_v47 = vshll.u32 %v3201_v40, 16  ;;  %v3202_v48 = vcombine.low %v1041_v45, %v3859_v42  ;;  %v3871_v52 = vld [vmem:[#allocation2 + $0x20] ss:$0 sps:$4 sm:$0x11]   ;;  %v1247_v56 = vrot.slane %v1245_v41, 1 }
  0x2f   : > { %v1042_v53 = vld [vmem:[#allocation2 + $0x18] sm:$0xe]  ;;  %v1048_v58 = vld [vmem:[#allocation2 + $0xc] sm:$0xe]  ;;  %v3875_v59 = vrot.slane %v503_v43, 1  ;;  %v5077_v0 = vshrl.u32 %v3850_v34, 16 }
  0x30   : > { %v1085_v54 = vrot.slane %v1083_v47, 1  ;;  %v1093_v57 = vshll.u32 %v3202_v48, 16  ;;  %v412_v60 = vld [vmem:[#allocation2 + $0x30] sm:$0xf]  ;;  %v413_v61 = vld [vmem:[#allocation2 + $0x34] sm:$0xf]  ;;  %v3203_v62 = vcombine.low %v1042_v53, %v3864_v49  ;;  %v3209_v63 = vcombine.low %v1048_v58, %v407_v27 }
  0x31   : > { %1194 = vrot.lane.b32.xlu1 %v3850_v34, %s3710_s9  ;;  %v515_v2 = vshll.u32 %v3848_v33, 16  ;;  %v3886_v3 = vld [vmem:[#allocation2 + $0x28] sm:$0xf]  ;;  %v1043_v4 = vld [vmem:[#allocation2 + $0x24] sm:$0xe]  ;;  %v1091_v5 = vshrl.u32 %v3202_v48, 16  ;;  %v1248_v10 = vor.u32 %v1247_v56, %v1243_v44  ;;  %v3901_v18 = vcombine.low %v412_v60, %v413_v61 }
  0x32   : > { %1166 = vrot.lane.b32.xlu0 %v1098_v38, %s3711_s10  ;;  %v1086_v1 = vor.u32 %v1085_v54, %v1081_v46  ;;  %v1095_v6 = vrot.slane %v1093_v57, 1  ;;  %v527_v7 = vshll.u32 %v3871_v52, 16  ;;  %v1103_v8 = vshll.u32 %v3203_v62, 16  ;;  %v3896_v12 = vld [vmem:[#allocation2 + $0x2c] ss:$0 sps:$4 sm:$0x11]  }
  0x33   : > { %v3894_v9 = vrot.slane %v707_v55, 1  ;;  %v1235_v11 = vshll.u32 %v3209_v63, 16  ;;  %v1101_v14 = vshrl.u32 %v3203_v62, 16  ;;  %v3204_v16 = vcombine.low %v1043_v4, %v3886_v3  ;;  %v1050_v17 = vld [vmem:[#allocation2 + $0x24] sm:$0xe]  ;;  %v3642_v37 = vld [vmem:[%s5071_s2 + $0x18] sm:$0xff]  }
  0x34   : > { %v1087_v13 = vsel %vm494_vm2, %v1086_v1, %v3875_v59  ;;  %v1105_v15 = vrot.slane %v1103_v8, 1  ;;  %v3903_v19 = vrot.slane %v515_v2, 1  ;;  %v695_v20 = vshll.u32 %v3839_v29, 16  ;;  %v3922_v32 = vld [vmem:[#allocation2 + $0x2c] ss:$0 sps:$4 sm:$0x11]   ;;  %3411 = vmatprep.subr.bf16.mxu1 %v3642_v37 }
  0x35   : > { %651 = vrot.lane.b32.xlu1 %v3868_v50, %s3710_s9  ;;  %v3211_v21 = vcombine.low %v1050_v17, %v411_v39  ;;  %v1096_v22 = vor.u32 %v1095_v6, %v1091_v5  ;;  %v3909_v23 = vrot.slane %v527_v7, 1  ;;  %v1233_v24 = vshrl.u32 %v3209_v63, 16  ;;  %v1051_v43 = vld [vmem:[#allocation2 + $0x30] sm:$0xe]  ;;  %3412 = vmatpush3.bf16.msra.mxu1 %v3642_v37  ;;  %v3959_v4 = vld [vmem:[#allocation2 + $0x34] sm:$0xf] }
  0x36   : > { %1314 = vrot.lane.b32.xlu0 %v5078_v51, %s3712_s13  ;;  %v1113_v26 = vshll.u32 %v3204_v16, 16  ;;  %v3920_v27 = vsel %vm494_vm2, %v1248_v10, %v3894_v9  ;;  %v1237_v31 = vrot.slane %v1235_v11, 1  ;;  %v1106_v38 = vor.u32 %v1105_v15, %v1101_v14  ;;  %v3645_v46 = vld [vmem:[%s5071_s2 + $0x10] sm:$0xff]   ;;  %v338_v6 = vld [vmem:[%s3789_s8 + $0x58] sm:$0xf] }
  0x37   : > { %5113 = vst [vmem:[#allocation3_spill] sm:$0xff] %v3909_v23  ;;  %v1255_v36 = vshll.u32 %v3211_v21, 16  ;;  %v539_v39 = vshll.u32 %v3896_v12, 16  ;;  %v1111_v40 = vshrl.u32 %v3204_v16, 16  ;;  %v1097_v44 = vsel %vm494_vm2, %v1096_v22, %v3903_v19  ;;  %3413 = vmatprep.subr.bf16.mxu1 %v3645_v46  ;;  %v1044_v5 = vld [vmem:[#allocation2 + $0x30] sm:$0xe] }
  0x38   : > { %v1115_v41 = vrot.slane %v1113_v26, 1  ;;  %v3932_v45 = vrot.slane %v695_v20, 1  ;;  %v1238_v47 = vor.u32 %v1237_v31, %v1233_v24  ;;  %v719_v48 = vshll.u32 %v3922_v32, 16  ;;  %364 = vst.msk [vmem:[#allocation2 + $0x58] sm:$0xf] %vm340_vm0, %v338_v6 }
  0x39   : > { %1318 = vrot.lane.b32.xlu1 %v5077_v0, %s3712_s13  ;;  %v1253_v53 = vshrl.u32 %v3211_v21, 16  ;;  %v1257_v54 = vrot.slane %v1255_v36, 1  ;;  %v1107_v55 = vsel %vm494_vm2, %v1106_v38, %v3909_v23  ;;  %v3943_v56 = vrot.slane %v539_v39, 1  ;;  %3414 = vmatpush3.bf16.msra.mxu1 %v3645_v46  ;;  %v3978_v15 = vld [vmem:[#allocation2 + $0x40] sm:$0xf] }
  0x3a   : > { %1160 = vrot.lane.b32.xlu0 %v1087_v13, %s3711_s10  ;;  %v1116_v57 = vor.u32 %v1115_v41, %v1111_v40  ;;  %v3212_v58 = vcombine.low %v1051_v43, %v413_v61  ;;  %v3951_v60 = vsel %vm494_vm2, %v1238_v47, %v3932_v45  ;;  %v3953_v62 = vrot.slane %v719_v48, 1  ;;  %v3957_v61 = vld [vmem:[#allocation2 + $0x38] ss:$0 sps:$4 sm:$0x11]   ;;  %v1045_v16 = vld [vmem:[#allocation2 + $0x3c] sm:$0xe] }
  0x3b   : > { %5114 = vst [vmem:[#allocation4_spill] sm:$0xff] %v3943_v56  ;;  %v1258_v63 = vor.u32 %v1257_v54, %v1253_v53  ;;  %v1108_v8 = vshrl.u32 %v3871_v52, 16  ;;  %v731_v10 = vshll.u32 %v3957_v61, 16  ;;  %v3205_v14 = vcombine.low %v1044_v5, %v3959_v4  ;;  %v3983_v20 = vld [vmem:[#allocation2 + $0x38] ss:$0 sps:$4 sm:$0x11]  }
  0x3c   : > { %5115 = vst [vmem:[#allocation5_spill] sm:$0xff] %v3953_v62  ;;  %v1117_v1 = vsel %vm494_vm2, %v1116_v57, %v3943_v56  ;;  %v1265_v2 = vshll.u32 %v3212_v58, 16  ;;  %v1263_v11 = vshrl.u32 %v3212_v58, 16  ;;  %v1118_v17 = vshrl.u32 %v3896_v12, 16  ;;  %v415_v21 = vld [vmem:[#allocation2 + $0x40] sm:$0xf] }
  0x3d   : > { %653 = vrot.lane.b32.xlu1 %v3901_v18, %s3710_s9  ;;  %v3967_v7 = vsel %vm494_vm2, %v1258_v63, %v3953_v62  ;;  %v366_v22 = vld [vmem:[%s3976_s30] sm:$0xf]  ;;  %v367_v24 = vld [vmem:[%s3976_s30 + $0x4] sm:$0xf]  ;;  %v3988_v26 = vrot.slane %v731_v10, 1  ;;  %v1123_v36 = vshll.u32 %v3205_v14, 16  ;;  %v3206_v37 = vcombine.low %v1045_v16, %v3978_v15 }
  0x3e   : > { %1316 = vrot.lane.b32.xlu0 %v3920_v27, %s3712_s13  ;;  %v1267_v13 = vrot.slane %v1265_v2, 1  ;;  %v1052_v38 = vld [vmem:[#allocation2 + $0x3c] sm:$0xe]  ;;  %373 = vst.msk [vmem:[#allocation2 + $0x60] sm:$0xf] %vm340_vm0, %v366_v22  ;;  %v551_v41 = vshll.u32 %v3983_v20, 16 }
  0x3f   : > { %5116 = vst [vmem:[#allocation6_spill] sm:$0xff] %v3988_v26  ;;  %374 = vst.msk [vmem:[#allocation2 + $0x64] sm:$0xf] %vm340_vm0, %v367_v24  ;;  %v339_v39 = vld [vmem:[%s3789_s8 + $0x5c] sm:$0x1]  ;;  %v3213_v43 = vcombine.low %v1052_v38, %v415_v21  ;;  %v1121_v46 = vshrl.u32 %v3205_v14, 16 }
  0x40   : > { %v1268_v31 = vor.u32 %v1267_v13, %v1263_v11  ;;  %365 = vst.msk [vmem:[#allocation2 + $0x5c] sm:$0x1] %vm343_vm1, %v339_v39  ;;  %v368_v40 = vld [vmem:[%s3976_s30 + $0x8] sm:$0x1]  ;;  %v1125_v47 = vrot.slane %v1123_v36, 1  ;;  %v1133_v53 = vshll.u32 %v3206_v37, 16 }
  0x41   : > { %1164 = vrot.lane.b32.xlu1 %v1097_v44, %s3711_s10  ;;  %375 = vst.msk [vmem:[#allocation2 + $0x68] sm:$0x1] %vm343_vm1, %v368_v40  ;;  %v4005_v48 = vld [vmem:[#allocation2 + $0x44] ss:$0 sps:$4 sm:$0x11]   ;;  %v5075_v54 = vshrl.u32 %v3957_v61, 16 }
  0x42   : > { %1168 = vrot.lane.b32.xlu0 %v1107_v55, %s3711_s10  ;;  %v4003_v44 = vsel %vm494_vm2, %v1268_v31, %v3988_v26  ;;  %v414_v55 = vld [vmem:[#allocation2 + $0x3c] sm:$0xf]  ;;  %v5076_v57 = vshrl.u32 %v3922_v32, 16  ;;  %v4013_v58 = vrot.slane %v551_v41, 1  ;;  %v1126_v2 = vor.u32 %v1125_v47, %v1121_v46  ;;  %v1053_v10 = vld [vmem:[#allocation2 + $0x48] sm:$0xe] }
  0x43   : > { %v4015_v63 = vld [vmem:[#allocation2 + $0x44] ss:$0 sps:$4 sm:$0x11]   ;;  %v563_v5 = vshll.u32 %v4005_v48, 16  ;;  %v1131_v6 = vshrl.u32 %v3206_v37, 16  ;;  %v4021_v11 = vcombine.low %v414_v55, %v415_v21  ;;  %v1128_v55 = vshrl.u32 %v3983_v20, 16 }
  0x44   : > { %5117 = vst [vmem:[#allocation7_spill] sm:$0xff] %v4013_v58  ;;  %v416_v13 = vld [vmem:[#allocation2 + $0x48] sm:$0xf]  ;;  %v417_v14 = vld [vmem:[#allocation2 + $0x4c] sm:$0xf]  ;;  %v743_v16 = vshll.u32 %v4015_v63, 16  ;;  %v1127_v24 = vsel %vm494_vm2, %v1126_v2, %v4013_v58 }
  0x45   : > { %1312 = vrot.lane.b32.xlu1 %v3951_v60, %s3712_s13  ;;  %5118 = vst [vmem:[#allocation8_spill] sm:$0xff] %v4021_v11  ;;  %v4029_v31 = vrot.slane %v563_v5, 1  ;;  %v3214_v37 = vcombine.low %v1053_v10, %v417_v14  ;;  %v4033_v21 = vcombine.low %v416_v13, %v417_v14  ;;  %v4040_v41 = vld [vmem:[#allocation2 + $0x50] ss:$0 sps:$4 sm:$0x11]   ;;  %v1138_v13 = vshrl.u32 %v4005_v48, 16 }
  0x46   : > { %1172 = vrot.lane.b32.xlu0 %v1117_v1, %s3711_s10  ;;  %v1275_v1 = vshll.u32 %v3213_v43, 16  ;;  %v4036_v38 = vrot.slane %v743_v16, 1  ;;  %v4042_v46 = vld [vmem:[#allocation2 + $0x4c] sm:$0xf]  ;;  %v1046_v47 = vld [vmem:[#allocation2 + $0x48] sm:$0xe] }
  0x47   : > { %5119 = vst [vmem:[#allocation9_spill] sm:$0xff] %v4029_v31  ;;  %v1283_v2 = vshrl.u32 %v3214_v37, 16  ;;  %v1047_v10 = vld [vmem:[#allocation2 + $0x54] sm:$0xe] }
  0x48   : > { %v1277_v22 = vrot.slane %v1275_v1, 1  ;;  %5120 = vst [vmem:[#allocation10_spill] sm:$0xff] %v4036_v38  ;;  %v755_v1 = vshll.u32 %v4040_v41, 16  ;;  %v4060_v14 = vld [vmem:[#allocation2 + $0x50] ss:$0 sps:$4 sm:$0x11]  }
  0x49   : > { %1320 = vrot.lane.b32.xlu1 %v3967_v7, %s3712_s13  ;;  %5122 = vst [vmem:[#allocation12_spill] sm:$0xff] %v4060_v14 }
  0x4a   : > { %1170 = vrot.lane.b32.xlu0 %v1108_v8, %s3711_s10  ;;  %v1135_v8 = vrot.slane %v1133_v53, 1  ;;  %v4062_v16 = vrot.slane %v755_v1, 1  ;;  %v4073_v1 = vld [vmem:[#allocation2 + $0x5c] ss:$0 sps:$4 sm:$0x11]  }
  0x4b   : > { %5124 = vst [vmem:[#allocation14_spill] sm:$0xff] %v4073_v1 }
  0x4c   : > { %v1136_v36 = vor.u32 %v1135_v8, %v1131_v6  ;;  %v3207_v6 = vcombine.low %v1046_v47, %v4042_v46  ;;  %v4054_v8 = vld [vmem:[#allocation2 + $0x58] sm:$0xf]  ;;  %5123 = vst [vmem:[#allocation13_spill] sm:$0xff] %v4062_v16 }
  0x4d   : > { %1196 = vrot.lane.b32.xlu1 %v3922_v32, %s3710_s9  ;;  %5121 = vst [vmem:[#allocation11_spill] sm:$0xff] %v4054_v8 }
  0x4e   : > { %1174 = vrot.lane.b32.xlu0 %v1118_v17, %s3711_s10  ;;  %v1273_v17 = vshrl.u32 %v3213_v43, 16  ;;  %v1137_v40 = vsel %vm494_vm2, %v1136_v36, %v4029_v31  ;;  %v1285_v43 = vshll.u32 %v3214_v37, 16  ;;  %v3208_v36 = vcombine.low %v1047_v10, %v4054_v8  ;;  %v1054_v37 = vld [vmem:[#allocation2 + $0x54] sm:$0xe] }
  0x4f   : > { %v1141_v47 = vshrl.u32 %v3207_v6, 16  ;;  %v418_v10 = vld [vmem:[#allocation2 + $0x54] sm:$0xf] }
  0x50   : > { %v1278_v39 = vor.u32 %v1277_v22, %v1273_v17  ;;  %v1287_v5 = vrot.slane %v1285_v43, 1  ;;  %v419_v22 = vld [vmem:[#allocation2 + $0x58] sm:$0xf] }
  0x51   : > { %1198 = vrot.lane.b32.xlu1 %v3957_v61, %s3710_s9  ;;  %v4090_v58 = vcombine.low %v418_v10, %v419_v22 }
  0x52   : > { %1324 = vrot.lane.b32.xlu0 %v4003_v44, %s3712_s13  ;;  %v4049_v53 = vsel %vm494_vm2, %v1278_v39, %v4036_v38  ;;  %v1288_v17 = vor.u32 %v1287_v5, %v1283_v2  ;;  %v575_v39 = vshll.u32 %v4060_v14, 16  ;;  %v1153_v2 = vshll.u32 %v3208_v36, 16  ;;  %v1055_v5 = vld [vmem:[#allocation2 + $0x60] sm:$0xe]  ;;  %v369_v38 = vld [vmem:[%s3976_s30 + $0xc] sm:$0xf] }
  0x53   : > { %5127 = vst [vmem:[#allocation16_spill] sm:$0xff] %v4090_v58  ;;  %376 = vst.msk [vmem:[#allocation2 + $0x6c] sm:$0xf] %vm340_vm0, %v369_v38 }
  0x54   : > { %v4071_v43 = vsel %vm494_vm2, %v1288_v17, %v4062_v16  ;;  %v4081_v17 = vrot.slane %v575_v39, 1  ;;  %v1155_v0 = vrot.slane %v1153_v2, 1  ;;  %v5126_v16 = vshrl.u32 %v4040_v41, 16  ;;  %v371_v39 = vld [vmem:[%s3976_s30 + $0x14] sm:$0x1] }
  0x55   : > { %1326 = vrot.lane.b32.xlu1 %v5075_v54, %s3712_s13  ;;  %v587_v54 = vshll.u32 %v4073_v1, 16  ;;  %378 = vst.msk [vmem:[#allocation2 + $0x74] sm:$0x1] %vm343_vm1, %v371_v39  ;;  %v4114_v39 = vld [vmem:[#allocation2 + $0x68] ss:$0 sps:$4 sm:$0x11]  }
  0x56   : > { %1322 = vrot.lane.b32.xlu0 %v5076_v57, %s3712_s13  ;;  %5125 = vst [vmem:[#allocation15_spill] sm:$0xff] %v4081_v17  ;;  %v1151_v57 = vshrl.u32 %v3208_v36, 16  ;;  %v421_v36 = vld [vmem:[#allocation2 + $0x64] sm:$0xf] }
  0x57   : > { %v3216_v10 = vcombine.low %v1055_v5, %v421_v36 }
  0x58   : > { %v1156_v38 = vor.u32 %v1155_v0, %v1151_v57  ;;  %v779_v57 = vshll.u32 %v4114_v39, 16 }
  0x59   : > { %655 = vrot.lane.b32.xlu1 %v4021_v11, %s3710_s9 }
  0x5a   : > { %1176 = vrot.lane.b32.xlu0 %v1127_v24, %s3711_s10  ;;  %v1143_v24 = vshll.u32 %v3207_v6, 16  ;;  %v4083_v6 = vld [vmem:[#allocation2 + $0x5c] ss:$0 sps:$4 sm:$0x11]  }
  0x5d   : > { %657 = vrot.lane.b32.xlu1 %v4033_v21, %s3710_s9 }
  0x5e   : > { %1180 = vrot.lane.b32.xlu0 %v1137_v40, %s3711_s10  ;;  %v3215_v40 = vcombine.low %v1054_v37, %v419_v22  ;;  %v4103_v22 = vrot.slane %v587_v54, 1  ;;  %v1148_v54 = vshrl.u32 %v4060_v14, 16  ;;  %v3635_v14 = vld [vmem:[#allocation2 + $0x2c] ss:$0 sps:$4 sm:$0x11]  }
  0x5f   : > { %v1920_v62 = vshll.u32 %v3635_v14, 16 }
  0x60   : > { %v1293_v51 = vshrl.u32 %v3215_v40, 16  ;;  %5129 = vst [vmem:[#allocation17_spill] sm:$0xff] %v4103_v22 }
  0x61   : > { %1328 = vrot.lane.b32.xlu1 %v4049_v53, %s3712_s13  ;;  %v1922_v11 = vrot.slane %v1920_v62, 1 }
  0x62   : > { %1178 = vrot.lane.b32.xlu0 %v1128_v55, %s3711_s10  ;;  %v1145_v55 = vrot.slane %v1143_v24, 1  ;;  %v1295_v24 = vshll.u32 %v3215_v40, 16  ;;  %v767_v40 = vshll.u32 %v4083_v6, 16 }
  0x64   : > { %v1146_v37 = vor.u32 %v1145_v55, %v1141_v47  ;;  %v5128_v47 = vshrl.u32 %v4015_v63, 16  ;;  %v420_v55 = vld [vmem:[#allocation2 + $0x60] sm:$0xf]  ;;  %v1297_v2 = vrot.slane %v1295_v24, 1  ;;  %v4110_v31 = vrot.slane %v767_v40, 1 }
  0x65   : > { %1200 = vrot.lane.b32.xlu1 %v4015_v63, %s3710_s9 }
  0x66   : > { %1182 = vrot.lane.b32.xlu0 %v1138_v13, %s3711_s10  ;;  %v370_v13 = vld [vmem:[%s3976_s30 + $0x10] sm:$0xf]  ;;  %5131 = vst [vmem:[#allocation19_spill] sm:$0xff] %v4110_v31  ;;  %v1298_v24 = vor.u32 %v1297_v2, %v1293_v51  ;;  %v1303_v51 = vshrl.u32 %v3216_v10, 16  ;;  %v1781_v2 = vld [vmem:[#allocation2 + $0x1c] sm:$0xf] }
  0x67   : > { %377 = vst.msk [vmem:[#allocation2 + $0x70] sm:$0xf] %vm340_vm0, %v370_v13  ;;  %v1157_v13 = vsel %vm494_vm2, %v1156_v38, %v4103_v22  ;;  %v1780_v38 = vld [vmem:[#allocation2 + $0x18] sm:$0xf]  ;;  %s3153_s30 = sshll.u32 %s3692_s18, 4 }
  0x68   : > { %v4121_v0 = vsel %vm494_vm2, %v1298_v24, %v4110_v31  ;;  %v1782_v24 = vld [vmem:[#allocation2 + $0x24] sm:$0xf]  ;;  %v3634_v31 = vld [vmem:[#allocation2 + $0x20] ss:$0 sps:$4 sm:$0x11]   ;;  %p307_p8 = scmp.lt.s32.totalorder %s3153_s30, 31 }
  0x69   : > { %1202 = vrot.lane.b32.xlu1 %v4040_v41, %s3710_s9 }
  0x6a   : > { %1332 = vrot.lane.b32.xlu0 %v4071_v43, %s3712_s13  ;;  %s5196_s30 = smov (!%p307_p8, %s3153_s30), 31 }
  0x6b   : > { %s3154_s6 = sshll.u32 %s5196_s30, 1 }
  0x6c   : > { %s311_s8 = sadd.s32 %s3155_s7, %s3154_s6 }
  0x6d   : > { %1334 = vrot.lane.b32.xlu1 %v5126_v16, %s3712_s13  ;;  %v1147_v16 = vsel %vm494_vm2, %v1146_v37, %v4081_v17  ;;  %v1305_v37 = vshll.u32 %v3216_v10, 16  ;;  %s3156_s18 = sshll.u32 %s311_s8, 2 }
  0x6e   : > { %1330 = vrot.lane.b32.xlu0 %v5128_v47, %s3712_s13  ;;  %v4107_v47 = vcombine.low %v420_v55, %v421_v36  ;;  %v1158_v55 = vshrl.u32 %v4073_v1, 16  ;;  %v4129_v36 = vrot.slane %v779_v57, 1  ;;  %v3231_v57 = vcombine.low %v1780_v38, %v1781_v2  ;;  %s4895_s12 = scalar_lea.vmem %s5074_s5, %s3156_s18 }
  0x6f   : > { %v1307_v5 = vrot.slane %v1305_v37, 1 }
  0x70   : > { %5130 = vst [vmem:[#allocation18_spill] sm:$0xff] %v4107_v47  ;;  %5132 = vst [vmem:[#allocation20_spill] sm:$0xff] %v4129_v36  ;;  %v1903_v17 = vshll.u32 %v3231_v57, 16 }
  0x71   : > { %659 = vrot.lane.b32.xlu1 %v4090_v58, %s3710_s9  ;;  %v1308_v40 = vor.u32 %v1307_v5, %v1303_v51  ;;  %v2239_v5 = vld [vmem:[#allocation2 + $0x24] sm:$0xe] }
  0x72   : > { %1184 = vrot.lane.b32.xlu0 %v1147_v16, %s3711_s10  ;;  %v2238_v16 = vld [vmem:[#allocation2 + $0x18] sm:$0xe]  ;;  %v1905_v58 = vrot.slane %v1903_v17, 1 }
  0x73   : > { %v3261_v10 = vcombine.low %v2238_v16, %v1781_v2  ;;  %v4136_v37 = vsel %vm494_vm2, %v1308_v40, %v4129_v36  ;;  %v1901_v40 = vshrl.u32 %v3231_v57, 16 }
  0x75   : > { %661 = vrot.lane.b32.xlu1 %v4107_v47, %s3710_s9  ;;  %v2321_v16 = vshll.u32 %v3261_v10, 16  ;;  %v2319_v2 = vshrl.u32 %v3261_v10, 16  ;;  %v1906_v8 = vor.u32 %v1905_v58, %v1901_v40  ;;  %v1787_v40 = vld [vmem:[#allocation2 + $0x40] sm:$0xf] }
  0x76   : > { %1188 = vrot.lane.b32.xlu0 %v1157_v13, %s3711_s10  ;;  %v1783_v13 = vld [vmem:[#allocation2 + $0x28] sm:$0xf] }
  0x77   : > { %v3232_v51 = vcombine.low %v1782_v24, %v1783_v13  ;;  %v3262_v38 = vcombine.low %v2239_v5, %v1783_v13  ;;  %v1908_v24 = vshll.u32 %v3634_v31, 16  ;;  %v2323_v36 = vrot.slane %v2321_v16, 1  ;;  %v1784_v13 = vld [vmem:[#allocation2 + $0x30] sm:$0xf]  ;;  %v2241_v16 = vld [vmem:[#allocation2 + $0x3c] sm:$0xe] }
  0x79   : > { %1336 = vrot.lane.b32.xlu1 %v4121_v0, %s3712_s13  ;;  %v1915_v22 = vshll.u32 %v3232_v51, 16  ;;  %v1913_v1 = vshrl.u32 %v3232_v51, 16  ;;  %v1910_v26 = vrot.slane %v1908_v24, 1  ;;  %v2331_v23 = vshll.u32 %v3262_v38, 16 }
  0x7a   : > { %1186 = vrot.lane.b32.xlu0 %v1148_v54, %s3711_s10  ;;  %v5095_v54 = vshrl.u32 %v4114_v39, 16  ;;  %v2329_v62 = vshrl.u32 %v3262_v38, 16  ;;  %v3264_v24 = vcombine.low %v2241_v16, %v1787_v40 }
  0x7b   : > { %v1917_v47 = vrot.slane %v1915_v22, 1  ;;  %v4158_v17 = vsel %vm494_vm2, %v1906_v8, %v1910_v26  ;;  %v2333_v58 = vrot.slane %v2331_v23, 1 }
  0x7c   : > { %5133 = vst [vmem:[#allocation21_spill] sm:$0xff] %v4158_v17 }
  0x7d   : > { %1204 = vrot.lane.b32.xlu1 %v4083_v6, %s3710_s9  ;;  %v1918_v56 = vor.u32 %v1917_v47, %v1913_v1  ;;  %v2334_v8 = vor.u32 %v2333_v58, %v2329_v62  ;;  %v1785_v1 = vld [vmem:[#allocation2 + $0x34] sm:$0xf] }
  0x7e   : > { %1190 = vrot.lane.b32.xlu0 %v1158_v55, %s3711_s10  ;;  %v5101_v55 = vshrl.u32 %v4083_v6, 16 }
  0x7f   : > { %v4155_v10 = vsel %vm494_vm2, %v1918_v56, %v1922_v11  ;;  %v5134_v56 = vshrl.u32 %v3839_v29, 16  ;;  %v2335_v23 = vsel %vm494_vm2, %v2334_v8, %v1922_v11  ;;  %v2326_v29 = vshrl.u32 %v3634_v31, 16  ;;  %v1786_v11 = vld [vmem:[#allocation2 + $0x3c] sm:$0xf] }
  0x80   : > { %v4193_v62 = vcombine.low %v1786_v11, %v1787_v40  ;;  %v2242_v40 = vld [vmem:[#allocation2 + $0x48] sm:$0xe] }
  0x81   : > { %1206 = vrot.lane.b32.xlu1 %v4114_v39, %s3710_s9 }
  0x82   : > { %1340 = vrot.lane.b32.xlu0 %v4136_v37, %s3712_s13 }
  0x85   : > { %1342 = vrot.lane.b32.xlu1 %v5095_v54, %s3712_s13  ;;  %v2324_v54 = vor.u32 %v2323_v36, %v2319_v2  ;;  %v2336_v36 = vshrl.u32 %v3635_v14, 16 }
  0x86   : > { %1338 = vrot.lane.b32.xlu0 %v5101_v55, %s3712_s13  ;;  %v1788_v55 = vld [vmem:[#allocation2 + $0x48] sm:$0xf] }
  0x87   : > { %v2325_v22 = vsel %vm494_vm2, %v2324_v54, %v1910_v26  ;;  %v5135_v26 = vshrl.u32 %v3850_v34, 16  ;;  %v4187_v34 = vcombine.low %v1784_v13, %v1785_v1 }
  0x89   : > { %1860 = vrot.lane.b32.xlu1 %v3231_v57, %s3710_s9  ;;  %v4180_v57 = vld [vmem:[#allocation2 + $0x38] ss:$0 sps:$4 sm:$0x11]  }
  0x8a   : > { %2246 = vrot.lane.b32.xlu0 %v3951_v60, %s3711_s10  ;;  %v4166_v60 = vld [vmem:[%s5071_s2 + $0x38] sm:$0xff]   ;;  %v1932_v2 = vshll.u32 %v4180_v57, 16 }
  0x8b   : > { %3451 = vmatprep.subr.bf16.mxu1 %v4166_v60 }
  0x8c   : > { %v4197_v58 = vrot.slane %v1932_v2, 1 }
  0x8d   : > { %1862 = vrot.lane.b32.xlu1 %v3232_v51, %s3710_s9 }
  0x8e   : > { %2250 = vrot.lane.b32.xlu0 %v3920_v27, %s3711_s10  ;;  %v2240_v27 = vld [vmem:[#allocation2 + $0x30] sm:$0xe]  ;;  %5137 = vst [vmem:[#allocation23_spill] sm:$0xff] %v4197_v58 }
  0x8f   : > { %v3263_v47 = vcombine.low %v2240_v27, %v1785_v1  ;;  %v2351_v1 = vshll.u32 %v3264_v24, 16  ;;  %v3641_v27 = vld [vmem:[#allocation2 + $0x44] ss:$0 sps:$4 sm:$0x11]  }
  0x91   : > { %2398 = vrot.lane.b32.xlu1 %v2325_v22, %s3712_s13  ;;  %v2341_v54 = vshll.u32 %v3263_v47, 16  ;;  %v2353_v13 = vrot.slane %v2351_v1, 1 }
  0x92   : > { %2248 = vrot.lane.b32.xlu0 %v5134_v56, %s3711_s10 }
  0x95   : > { %2278 = vrot.lane.b32.xlu1 %v3634_v31, %s3710_s9  ;;  %v2343_v31 = vrot.slane %v2341_v54, 1  ;;  %v5138_v54 = vshrl.u32 %v3922_v32, 16 }
  0x96   : > { %2252 = vrot.lane.b32.xlu0 %v5135_v26, %s3711_s10 }
  0x99   : > { %2280 = vrot.lane.b32.xlu1 %v3635_v14, %s3710_s9  ;;  %v2339_v14 = vshrl.u32 %v3263_v47, 16 }
  0x9a   : > { %2402 = vrot.lane.b32.xlu0 %v2335_v23, %s3712_s13  ;;  %v2349_v23 = vshrl.u32 %v3264_v24, 16  ;;  %v383_v24 = vld [vmem:[#allocation2 + $0xc] sm:$0xf] }
  0x9b   : > { %v4182_v51 = vpop.permute.xlu1 %649  ;;  %v2344_v56 = vor.u32 %v2343_v31, %v2339_v14  ;;  %v381_v31 = vld [vmem:[#allocation2] sm:$0xf] }
  0x9c   : > { %5136 = vst [vmem:[#allocation22_spill] sm:$0xff] %v4182_v51  ;;  %v4184_v5 = vpop.permute.xlu0 %647  ;;  %v2354_v14 = vor.u32 %v2353_v13, %v2349_v23  ;;  %v4223_v23 = vcombine.low %v381_v31, %v3852_v35  ;;  %v4226_v13 = vcombine.low %v383_v24, %v3859_v42 }
  0x9d   : > { %2404 = vrot.lane.b32.xlu1 %v2336_v36, %s3712_s13  ;;  %v2345_v47 = vsel %vm494_vm2, %v2344_v56, %v4197_v58  ;;  %v5140_v56 = vshrl.u32 %v3957_v61, 16  ;;  %v4229_v61 = vld [vmem:[#allocation2 + $0x50] ss:$0 sps:$4 sm:$0x11]  }
  0x9e   : > { %2400 = vrot.lane.b32.xlu0 %v2326_v29, %s3712_s13 }
  0x9f   : > { %v1193_v38 = vpop.permute.xlu1 %1192 }
  0xa0   : > { %v1163_v22 = vpop.permute.xlu0 %1162 }
  0xa1   : > { %1864 = vrot.lane.b32.xlu1 %v4187_v34, %s3710_s9 }
  0xa2   : > { %2254 = vrot.lane.b32.xlu0 %v3967_v7, %s3711_s10  ;;  %v1944_v7 = vshll.u32 %v3641_v27, 16 }
  0xa3   : > { %v1195_v8 = vpop.permute.xlu1 %1194 }
  0xa4   : > { %v1167_v26 = vpop.permute.xlu0 %1166  ;;  %v4211_v11 = vrot.slane %v1944_v7, 1 }
  0xa5   : > { %1866 = vrot.lane.b32.xlu1 %v4193_v62, %s3710_s9  ;;  %v1351_v31 = vsel %vm799_vm3, %v3848_v33, %v1167_v26  ;;  %v1956_v26 = vshll.u32 %v4229_v61, 16 }
  0xa6   : > { %2258 = vrot.lane.b32.xlu0 %v4003_v44, %s3711_s10  ;;  %5139 = vst [vmem:[#allocation24_spill] sm:$0xff] %v4211_v11  ;;  %v1789_v44 = vld [vmem:[#allocation2 + $0x4c] sm:$0xf] }
  0xa7   : > { %v4205_v36 = vpop.permute.xlu1 %651  ;;  %v3265_v1 = vcombine.low %v2242_v40, %v1789_v44  ;;  %v1347_v40 = vsel %vm799_vm3, %v3843_v30, %v1163_v22  ;;  %v4241_v58 = vcombine.low %v1788_v55, %v1789_v44  ;;  %v2243_v30 = vld [vmem:[#allocation2 + $0x54] sm:$0xe]  ;;  %v1791_v44 = vld [vmem:[#allocation2 + $0x58] sm:$0xf] }
  0xa8   : > { %v1315_v29 = vpop.permute.xlu0 %1314  ;;  %v1378_v22 = vsel %vm816_vm4, %v1347_v40, %v1193_v38  ;;  %v1790_v55 = vld [vmem:[#allocation2 + $0x54] sm:$0xf] }
  0xa9   : > { %2406 = vrot.lane.b32.xlu1 %v2345_v47, %s3712_s13  ;;  %v2355_v47 = vsel %vm494_vm2, %v2354_v14, %v4211_v11  ;;  %v2346_v14 = vshrl.u32 %v4180_v57, 16  ;;  %v2361_v35 = vshll.u32 %v3265_v1, 16  ;;  %v2359_v33 = vshrl.u32 %v3265_v1, 16 }
  0xaa   : > { %2256 = vrot.lane.b32.xlu0 %v5138_v54, %s3711_s10  ;;  %v2356_v54 = vshrl.u32 %v3641_v27, 16  ;;  %v1381_v11 = vsel %vm816_vm4, %v1351_v31, %v1195_v8 }
  0xab   : > { %v1319_v16 = vpop.permute.xlu1 %1318  ;;  %v2363_v38 = vrot.slane %v2361_v35, 1  ;;  %v4261_v35 = vcombine.low %v1790_v55, %v1791_v44 }
  0xac   : > { %v1161_v2 = vpop.permute.xlu0 %1160  ;;  %v1407_v40 = vsel %vm833_vm5, %v1381_v11, %v1319_v16 }
  0xad   : > { %2282 = vrot.lane.b32.xlu1 %v4180_v57, %s3710_s9  ;;  %v1448_v16 = vshll.u32 %v1407_v40, 16 }
  0xae   : > { %2260 = vrot.lane.b32.xlu0 %v5140_v56, %s3711_s10 }
  0xaf   : > { %v4218_v32 = vpop.permute.xlu1 %653 }
  0xb0   : > { %v1317_v7 = vpop.permute.xlu0 %1316 }
  0xb1   : > { %2284 = vrot.lane.b32.xlu1 %v3641_v27, %s3710_s9  ;;  %v1345_v27 = vsel %vm799_vm3, %v4223_v23, %v1161_v2  ;;  %v1403_v2 = vsel %vm833_vm5, %v1378_v22, %v1315_v29  ;;  %v387_v22 = vld [vmem:[#allocation2 + $0x24] sm:$0xf] }
  0xb2   : > { %2410 = vrot.lane.b32.xlu0 %v2355_v47, %s3712_s13  ;;  %v385_v47 = vld [vmem:[#allocation2 + $0x18] sm:$0xf]  ;;  %v1376_v1 = vsel %vm816_vm4, %v1345_v27, %v4184_v5  ;;  %v4265_v27 = vrot.slane %v1956_v26, 1  ;;  %v4272_v40 = vcombine.low %v387_v22, %v3886_v3  ;;  %v3657_v3 = vld [vmem:[%s5071_s2 + $0x30] sm:$0xff]  }
  0xb3   : > { %v1165_v42 = vpop.permute.xlu1 %1164  ;;  %v4256_v17 = vcombine.low %v385_v47, %v3864_v49  ;;  %v2364_v49 = vor.u32 %v2363_v38, %v2359_v33 }
  0xb4   : > { %v1349_v24 = vsel %vm799_vm3, %v4226_v13, %v1165_v42  ;;  %v1169_v56 = vpop.permute.xlu0 %1168 }
  0xb5   : > { %v1379_v57 = vsel %vm816_vm4, %v1349_v24, %v4182_v51  ;;  %2412 = vrot.lane.b32.xlu1 %v2356_v54, %s3712_s13  ;;  %v3266_v54 = vcombine.low %v2243_v30, %v1791_v44  ;;  %v2365_v33 = vsel %vm494_vm2, %v2364_v49, %v4265_v27 }
  0xb6   : > { %v1405_v42 = vsel %vm833_vm5, %v1379_v57, %v1317_v7  ;;  %2408 = vrot.lane.b32.xlu0 %v2346_v14, %s3712_s13  ;;  %v1438_v7 = vshll.u32 %v1403_v2, 16  ;;  %v4267_v2 = vld [vmem:[#allocation2 + $0x5c] ss:$0 sps:$4 sm:$0x11]  }
  0xb7   : > { %v1444_v24 = vshll.u32 %v1405_v42, 16  ;;  %v1313_v51 = vpop.permute.xlu1 %1312  ;;  %v1442_v11 = vshrl.u32 %v1405_v42, 16  ;;  %v2371_v47 = vshll.u32 %v3266_v54, 16  ;;  %v1353_v42 = vsel %vm799_vm3, %v4256_v17, %v1169_v56 }
  0xb8   : > { %v1401_v8 = vsel %vm833_vm5, %v1376_v1, %v1313_v51  ;;  %v1173_v29 = vpop.permute.xlu0 %1172  ;;  %v1440_v55 = vrot.slane %v1438_v7, 1  ;;  %v2369_v26 = vshrl.u32 %v3266_v54, 16  ;;  %v1968_v56 = vshll.u32 %v4267_v2, 16 }
  0xb9   : > { %v1446_v31 = vrot.slane %v1444_v24, 1  ;;  %v1434_v14 = vshll.u32 %v1401_v8, 16  ;;  %1868 = vrot.lane.b32.xlu1 %v4241_v58, %s3710_s9  ;;  %v1432_v30 = vshrl.u32 %v1401_v8, 16  ;;  %v2373_v7 = vrot.slane %v2371_v47, 1  ;;  %v2244_v47 = vld [vmem:[#allocation2 + $0x60] sm:$0xe] }
  0xba   : > { %2262 = vrot.lane.b32.xlu0 %v4049_v53, %s3711_s10  ;;  %v1450_v53 = vrot.slane %v1448_v16, 1  ;;  %v1357_v54 = vsel %vm799_vm3, %v4272_v40, %v1173_v29  ;;  %v4298_v49 = vrot.slane %v1968_v56, 1  ;;  %v2366_v56 = vshrl.u32 %v4229_v61, 16 }
  0xbb   : > { %v1436_v51 = vrot.slane %v1434_v14, 1  ;;  %v1321_v57 = vpop.permute.xlu1 %1320  ;;  %v1447_v1 = vor.u32 %v1446_v31, %v1442_v11  ;;  %v1382_v31 = vsel %vm816_vm4, %v1353_v42, %v4205_v36  ;;  %v5141_v11 = vshrl.u32 %v4015_v63, 16 }
  0xbc   : > { %v1171_v24 = vpop.permute.xlu0 %1170  ;;  %v1409_v16 = vsel %vm833_vm5, %v1382_v31, %v1321_v57  ;;  %v1385_v57 = vsel %vm816_vm4, %v1357_v54, %v4218_v32  ;;  %v5142_v42 = vshrl.u32 %v4040_v41, 16 }
  0xbd   : > { %v1437_v44 = vor.u32 %v1436_v51, %v1432_v30  ;;  %1870 = vrot.lane.b32.xlu1 %v4261_v35, %s3710_s9  ;;  %v2374_v30 = vor.u32 %v2373_v7, %v2369_v26  ;;  %v1793_v51 = vld [vmem:[#allocation2 + $0x64] sm:$0xf]  ;;  %v1454_v29 = vshll.u32 %v1409_v16, 16 }
  0xbe   : > { %2266 = vrot.lane.b32.xlu0 %v4071_v43, %s3711_s10  ;;  %v1451_v43 = vsel %vm494_vm2, %v1447_v1, %v1450_v53  ;;  %v1355_v53 = vsel %vm799_vm3, %v3871_v52, %v1171_v24  ;;  %v2376_v52 = vshrl.u32 %v4267_v2, 16  ;;  %v1792_v24 = vld [vmem:[#allocation2 + $0x60] sm:$0xf] }
  0xbf   : > { %v1197_v38 = vpop.permute.xlu1 %1196  ;;  %v1441_v8 = vsel %vm494_vm2, %v1437_v44, %v1440_v55  ;;  %v3267_v44 = vcombine.low %v2244_v47, %v1793_v51  ;;  %v1456_v7 = vrot.slane %v1454_v29, 1 }
  0xc0   : > { %v1175_v14 = vpop.permute.xlu0 %1174  ;;  %3415 = vmatprep.mubr.msk.bf16.mxu1 %vm866_vm6, %v1441_v8  ;;  %v2375_v8 = vsel %vm494_vm2, %v2374_v30, %v4298_v49 }
  0xc1   : > { %2414 = vrot.lane.b32.xlu1 %v2365_v33, %s3712_s13  ;;  %3416 = vmatmul.mubr.msk.bf16.vlgmr.msra.gmra.mxu1 %vm866_vm6, %v1451_v43  ;;  %v1359_v63 = vsel %vm799_vm3, %v3896_v12, %v1175_v14  ;;  %v1384_v12 = vsel %vm816_vm4, %v1355_v53, %v1197_v38  ;;  %v4323_v38 = vld [vmem:[#allocation2 + $0x68] ss:$0 sps:$4 sm:$0x11]  }
  0xc2   : > { %2264 = vrot.lane.b32.xlu0 %v5141_v11, %s3711_s10  ;;  %3452 = vmatpush3.bf16.msra.mxu1 %v4166_v60  ;;  %v1452_v11 = vshrl.u32 %v1409_v16, 16  ;;  %v4329_v16 = vcombine.low %v1792_v24, %v1793_v51 }
  0xc3   : > { %v1199_v22 = vpop.permute.xlu1 %1198  ;;  %3453 = vmatprep.subr.bf16.mxu1 %v3657_v3 }
  0xc4   : > { %v1325_v1 = vpop.permute.xlu0 %1324  ;;  %v1387_v33 = vsel %vm816_vm4, %v1359_v63, %v1199_v22  ;;  %v2245_v63 = vld [vmem:[#allocation2 + $0x6c] sm:$0xe] }
  0xc5   : > { %v1413_v55 = vsel %vm833_vm5, %v1385_v57, %v1325_v1  ;;  %2286 = vrot.lane.b32.xlu1 %v4229_v61, %s3710_s9  ;;  %v2381_v61 = vshll.u32 %v3267_v44, 16  ;;  %v1457_v57 = vor.u32 %v1456_v7, %v1452_v11 }
  0xc6   : > { %v1464_v60 = vshll.u32 %v1413_v55, 16  ;;  %2268 = vrot.lane.b32.xlu0 %v5142_v42, %s3711_s10  ;;  %3454 = vmatpush3.bf16.msra.mxu1 %v3657_v3  ;;  %v1462_v43 = vshrl.u32 %v1413_v55, 16  ;;  %v2379_v42 = vshrl.u32 %v3267_v44, 16 }
  0xc7   : > { %v1327_v26 = vpop.permute.xlu1 %1326  ;;  %v2383_v7 = vrot.slane %v2381_v61, 1 }
  0xc8   : > { %v1466_v31 = vrot.slane %v1464_v60, 1  ;;  %v1415_v41 = vsel %vm833_vm5, %v1387_v33, %v1327_v26  ;;  %v1323_v14 = vpop.permute.xlu0 %1322  ;;  %v389_v60 = vld [vmem:[#allocation2 + $0x30] sm:$0xf]  ;;  %v1794_v33 = vld [vmem:[#allocation2 + $0x6c] sm:$0xf] }
  0xc9   : > { %v1468_v3 = vshll.u32 %v1415_v41, 16  ;;  %v1411_v54 = vsel %vm833_vm5, %v1384_v12, %v1323_v14  ;;  %2288 = vrot.lane.b32.xlu1 %v4267_v2, %s3710_s9  ;;  %v1795_v26 = vld [vmem:[#allocation2 + $0x70] sm:$0xf]  ;;  %v4339_v51 = vcombine.low %v389_v60, %v3959_v4  ;;  %v702_v60 = vshll.u32 %v3835_v25, 16 }
  0xca   : > { %v1458_v22 = vshll.u32 %v1411_v54, 16  ;;  %2418 = vrot.lane.b32.xlu0 %v2375_v8, %s3712_s13  ;;  %v1467_v30 = vor.u32 %v1466_v31, %v1462_v43  ;;  %v1980_v8 = vshll.u32 %v4323_v38, 16  ;;  %v3268_v31 = vcombine.low %v2245_v63, %v1795_v26 }
  0xcb   : > { %v1470_v47 = vrot.slane %v1468_v3, 1  ;;  %v4325_v29 = vpop.permute.xlu1 %655  ;;  %5145 = vst [vmem:[#allocation27_spill] sm:$0xff] %v4339_v51  ;;  %v4343_v44 = vcombine.low %v1794_v33, %v1795_v26  ;;  %v2384_v43 = vor.u32 %v2383_v7, %v2379_v42  ;;  %v5146_v42 = vshrl.u32 %v4083_v6, 16 }
  0xcc   : > { %5143 = vst [vmem:[#allocation25_spill] sm:$0xff] %v4325_v29  ;;  %v1460_v1 = vrot.slane %v1458_v22, 1  ;;  %v1177_v55 = vpop.permute.xlu0 %1176  ;;  %v4347_v14 = vrot.slane %v1980_v8, 1  ;;  %v2391_v54 = vshll.u32 %v3268_v31, 16  ;;  %v510_v22 = vshll.u32 %v4226_v13, 16 }
  0xcd   : > { %2420 = vrot.lane.b32.xlu1 %v2376_v52, %s3712_s13  ;;  %v1471_v2 = vsel %vm494_vm2, %v1467_v30, %v1470_v47  ;;  %v4349_v52 = vld [vmem:[#allocation2 + $0x74] ss:$0 sps:$4 sm:$0x11]   ;;  %v1361_v4 = vsel %vm799_vm3, %v4339_v51, %v1177_v55  ;;  %v2389_v61 = vshrl.u32 %v3268_v31, 16 }
  0xce   : > { %2416 = vrot.lane.b32.xlu0 %v2366_v56, %s3712_s13  ;;  %v1461_v53 = vsel %vm494_vm2, %v1457_v57, %v1460_v1  ;;  %v391_v56 = vld [vmem:[#allocation2 + $0x3c] sm:$0xf]  ;;  %v1992_v47 = vshll.u32 %v4349_v52, 16  ;;  %v2393_v57 = vrot.slane %v2391_v54, 1  ;;  %v512_v33 = vrot.slane %v510_v22, 1  ;;  %v3659_v22 = vld [vmem:[%s5071_s2] sm:$0xff]  }
  0xcf   : > { %3419 = vmatprep.mubr.msk.bf16.mxu1 %vm866_vm6, %v1461_v53  ;;  %v4335_v12 = vpop.permute.xlu1 %657  ;;  %v4354_v11 = vcombine.low %v391_v56, %v3978_v15  ;;  %v1388_v15 = vsel %vm816_vm4, %v1361_v4, %v4325_v29  ;;  %v508_v53 = vshrl.u32 %v4226_v13, 16  ;;  %v700_v4 = vshrl.u32 %v3835_v25, 16 }
  0xd0   : > { %5144 = vst [vmem:[#allocation26_spill] sm:$0xff] %v4335_v12  ;;  %v1181_v41 = vpop.permute.xlu0 %1180  ;;  %3420 = vmatmul.mubr.msk.bf16.gmra.mxu1 %vm866_vm6, %v1471_v2  ;;  %v3658_v2 = vld [vmem:[%s5071_s2 + $0x8] sm:$0xff]   ;;  %v4379_v8 = vrot.slane %v1992_v47, 1  ;;  %v2394_v7 = vor.u32 %v2393_v57, %v2389_v61  ;;  %v5147_v57 = vshrl.u32 %v4114_v39, 16 }
  0xd1   : > { %1872 = vrot.lane.b32.xlu1 %v4329_v16, %s3710_s9  ;;  %v1365_v55 = vsel %vm799_vm3, %v4354_v11, %v1181_v41  ;;  %3391 = vmatprep.subr.bf16.mxu0 %v3658_v2 }
  0xd2   : > { %2270 = vrot.lane.b32.xlu0 %v4121_v0, %s3711_s10  ;;  %v2385_v0 = vsel %vm494_vm2, %v2384_v43, %v4347_v14  ;;  %v1391_v41 = vsel %vm816_vm4, %v1365_v55, %v4335_v12  ;;  %v2386_v43 = vshrl.u32 %v4323_v38, 16  ;;  %3392 = vmatpush3.bf16.msra.mxu0 %v3658_v2  ;;  %v690_v55 = vshll.u32 %v3837_v28, 16 }
  0xd3   : > { %v1329_v3 = vpop.permute.xlu1 %1328  ;;  %v2395_v2 = vsel %vm494_vm2, %v2394_v7, %v4379_v8  ;;  %3393 = vmatprep.subr.bf16.mxu0 %v3659_v22 }
  0xd4   : > { %v1179_v24 = vpop.permute.xlu0 %1178  ;;  %v1417_v63 = vsel %vm833_vm5, %v1388_v15, %v1329_v3  ;;  %v496_v3 = vshrl.u32 %v4223_v23, 16  ;;  %v513_v15 = vor.u32 %v512_v33, %v508_v53 }
  0xd5   : > { %1874 = vrot.lane.b32.xlu1 %v4343_v44, %s3710_s9  ;;  %v1474_v31 = vshll.u32 %v1417_v63, 16 }
  0xd6   : > { %2274 = vrot.lane.b32.xlu0 %v4136_v37, %s3711_s10  ;;  %v498_v37 = vshll.u32 %v4223_v23, 16  ;;  %3394 = vmatpush3.bf16.msra.mxu0 %v3659_v22  ;;  %v522_v22 = vshll.u32 %v4256_v17, 16 }
  0xd7   : > { %v1201_v30 = vpop.permute.xlu1 %1200 }
  0xd8   : > { %v1183_v1 = vpop.permute.xlu0 %1182  ;;  %v500_v54 = vrot.slane %v498_v37, 1 }
  0xd9   : > { %2422 = vrot.lane.b32.xlu1 %v2385_v0, %s3712_s13  ;;  %v704_v0 = vrot.slane %v702_v60, 1  ;;  %v1367_v61 = vsel %vm799_vm3, %v4005_v48, %v1183_v1  ;;  %v1476_v48 = vrot.slane %v1474_v31, 1 }
  0xda   : > { %2272 = vrot.lane.b32.xlu0 %v5146_v42, %s3711_s10  ;;  %v534_v42 = vshll.u32 %v4272_v40, 16  ;;  %v501_v31 = vor.u32 %v500_v54, %v496_v3  ;;  %v518_v3 = vsel %vm494_vm2, %v513_v15, %v3903_v19  ;;  %v520_v19 = vshrl.u32 %v4256_v17, 16 }
  0xdb   : > { %v1203_v26 = vpop.permute.xlu1 %1202  ;;  %v705_v54 = vor.u32 %v704_v0, %v700_v4  ;;  %v524_v4 = vrot.slane %v522_v22, 1  ;;  %v558_v0 = vshll.u32 %v4354_v11, 16  ;;  %v5151_v22 = vld [vmem:[#allocation11_spill] sm:$0xff] }
  0xdc   : > { %v1333_v56 = vpop.permute.xlu0 %1332  ;;  %v1393_v37 = vsel %vm816_vm4, %v1367_v61, %v1203_v26  ;;  %v1472_v26 = vshrl.u32 %v1417_v63, 16 }
  0xdd   : > { %v1421_v6 = vsel %vm833_vm5, %v1391_v41, %v1333_v56  ;;  %2290 = vrot.lane.b32.xlu1 %v4323_v38, %s3710_s9  ;;  %v1363_v38 = vsel %vm799_vm3, %v3983_v20, %v1179_v24  ;;  %v2396_v24 = vshrl.u32 %v4349_v52, 16 }
  0xde   : > { %v1484_v47 = vshll.u32 %v1421_v6, 16  ;;  %2276 = vrot.lane.b32.xlu0 %v5147_v57, %s3711_s10  ;;  %v1390_v1 = vsel %vm816_vm4, %v1363_v38, %v1201_v30  ;;  %v1482_v41 = vshrl.u32 %v1421_v6, 16  ;;  %v688_v30 = vshrl.u32 %v3837_v28, 16 }
  0xdf   : > { %v1335_v60 = vpop.permute.xlu1 %1334  ;;  %v692_v6 = vrot.slane %v690_v55, 1  ;;  %v1477_v38 = vor.u32 %v1476_v48, %v1472_v26  ;;  %v506_v48 = vsel %vm494_vm2, %v501_v31, %v3875_v59 }
  0xe0   : > { %v1486_v39 = vrot.slane %v1484_v47, 1  ;;  %v1423_v53 = vsel %vm833_vm5, %v1393_v37, %v1335_v60  ;;  %v1331_v33 = vpop.permute.xlu0 %1330 }
  0xe1   : > { %v1488_v56 = vshll.u32 %v1423_v53, 16  ;;  %v1419_v20 = vsel %vm833_vm5, %v1390_v1, %v1331_v33  ;;  %2292 = vrot.lane.b32.xlu1 %v4349_v52, %s3710_s9  ;;  %v532_v1 = vshrl.u32 %v4272_v40, 16  ;;  %v536_v52 = vrot.slane %v534_v42, 1 }
  0xe2   : > { %v1478_v7 = vshll.u32 %v1419_v20, 16  ;;  %2426 = vrot.lane.b32.xlu0 %v2395_v2, %s3712_s13  ;;  %v1487_v61 = vor.u32 %v1486_v39, %v1482_v41  ;;  %v393_v2 = vld [vmem:[#allocation2 + $0x48] sm:$0xf]  ;;  %v726_v39 = vshll.u32 %v3901_v18, 16  ;;  %v714_v42 = vshll.u32 %v3868_v50, 16 }
  0xe3   : > { %v1490_v47 = vrot.slane %v1488_v56, 1  ;;  %v4412_v57 = vpop.permute.xlu1 %659  ;;  %v693_v33 = vor.u32 %v692_v6, %v688_v30  ;;  %v537_v15 = vor.u32 %v536_v52, %v532_v1  ;;  %v4433_v59 = vcombine.low %v393_v2, %v4042_v46  ;;  %v395_v41 = vld [vmem:[#allocation2 + $0x54] sm:$0xf]  ;;  %v5153_v1 = vld [vmem:[#allocation4_spill] sm:$0xff] }
  0xe4   : > { %5148 = vst [vmem:[#allocation28_spill] sm:$0xff] %v4412_v57  ;;  %v1480_v37 = vrot.slane %v1478_v7, 1  ;;  %v1185_v60 = vpop.permute.xlu0 %1184  ;;  %v4438_v56 = vsel %vm494_vm2, %v705_v54, %v3894_v9  ;;  %v724_v20 = vshrl.u32 %v3901_v18, 16  ;;  %v728_v26 = vrot.slane %v726_v39, 1  ;;  %v5154_v54 = vld [vmem:[#allocation8_spill] sm:$0xff] }
  0xe5   : > { %2428 = vrot.lane.b32.xlu1 %v2396_v24, %s3712_s13  ;;  %v1491_v63 = vsel %vm494_vm2, %v1487_v61, %v1490_v47  ;;  %5150 = vst [vmem:[#allocation30_spill] sm:$0xff] %v4433_v59  ;;  %v546_v24 = vshll.u32 %v4339_v51, 16  ;;  %v712_v7 = vshrl.u32 %v3868_v50, 16  ;;  %v716_v31 = vrot.slane %v714_v42, 1 }
  0xe6   : > { %2424 = vrot.lane.b32.xlu0 %v2386_v43, %s3712_s13  ;;  %v1481_v55 = vsel %vm494_vm2, %v1477_v38, %v1480_v37  ;;  %v750_v46 = vshll.u32 %v4033_v21, 16  ;;  %v4447_v61 = vsel %vm494_vm2, %v693_v33, %v3932_v45  ;;  %v525_v47 = vor.u32 %v524_v4, %v520_v19  ;;  %v5155_v19 = vld [vmem:[#allocation3_spill] sm:$0xff] }
  0xe7   : > { %3423 = vmatprep.mubr.msk.bf16.mxu1 %vm866_vm6, %v1481_v55  ;;  %v4427_v53 = vpop.permute.xlu1 %661  ;;  %v556_v9 = vshrl.u32 %v4354_v11, 16  ;;  %v560_v6 = vrot.slane %v558_v0, 1  ;;  %v4451_v38 = vcombine.low %v395_v41, %v5151_v22  ;;  %v542_v52 = vsel %vm494_vm2, %v537_v15, %v5153_v1 }
  0xe8   : > { %5149 = vst [vmem:[#allocation29_spill] sm:$0xff] %v4427_v53  ;;  %v1189_v43 = vpop.permute.xlu0 %1188  ;;  %3424 = vmatmul.mubr.msk.bf16.gmra.mxu1 %vm866_vm6, %v1491_v63  ;;  %v1369_v63 = vsel %vm799_vm3, %v4433_v59, %v1185_v60  ;;  %v544_v45 = vshrl.u32 %v4339_v51, 16  ;;  %v738_v2 = vshll.u32 %v5154_v54, 16  ;;  %v729_v55 = vor.u32 %v728_v26, %v724_v20 }
  0xe9   : > { %593 = vrot.lane.b32.xlu1 %v518_v3, %s3711_s10  ;;  %5152 = vst [vmem:[#allocation11_spill] sm:$0xff] %v4451_v38  ;;  %v548_v3 = vrot.slane %v546_v24, 1  ;;  %v748_v39 = vshrl.u32 %v4033_v21, 16  ;;  %v752_v42 = vrot.slane %v750_v46, 1  ;;  %v530_v60 = vsel %vm494_vm2, %v525_v47, %v5155_v19  ;;  %v5156_v46 = vld [vmem:[#allocation6_spill] sm:$0xff] }
  0xea   : > { %591 = vrot.lane.b32.xlu0 %v506_v48, %s3711_s10  ;;  %v717_v48 = vor.u32 %v716_v31, %v712_v7  ;;  %v561_v4 = vor.u32 %v560_v6, %v556_v9  ;;  %v1394_v0 = vsel %vm816_vm4, %v1369_v63, %v4412_v57  ;;  %v736_v41 = vshrl.u32 %v5154_v54, 16  ;;  %v5157_v9 = vld [vmem:[#allocation5_spill] sm:$0xff] }
  0xeb   : > { %v1337_v30 = vpop.permute.xlu1 %1336  ;;  %v582_v24 = vshll.u32 %v4451_v38, 16  ;;  %v1373_v20 = vsel %vm799_vm3, %v4451_v38, %v1189_v43  ;;  %v549_v7 = vor.u32 %v548_v3, %v544_v45  ;;  %v740_v31 = vrot.slane %v738_v2, 1  ;;  %v5158_v63 = vld [vmem:[#allocation9_spill] sm:$0xff] }
  0xec   : > { %v1187_v37 = vpop.permute.xlu0 %1186  ;;  %v1425_v26 = vsel %vm833_vm5, %v1394_v0, %v1337_v30  ;;  %v4477_v47 = vsel %vm494_vm2, %v729_v55, %v5156_v46  ;;  %v4481_v6 = vsel %vm494_vm2, %v717_v48, %v5157_v9  ;;  %v753_v22 = vor.u32 %v752_v42, %v748_v39  ;;  %v5160_v42 = vld [vmem:[#allocation7_spill] sm:$0xff]  ;;  %v5161_v9 = vld [vmem:[#allocation14_spill] sm:$0xff] }
  0xed   : > { %785 = vrot.lane.b32.xlu1 %v4438_v56, %s3712_s13  ;;  %v566_v43 = vsel %vm494_vm2, %v561_v4, %v5158_v63  ;;  %v580_v30 = vshrl.u32 %v4451_v38, 16  ;;  %v570_v45 = vshll.u32 %v4433_v59, 16  ;;  %v1494_v3 = vshll.u32 %v1425_v26, 16 }
  0xee   : > { %783 = vrot.lane.b32.xlu0 %v4447_v61, %s3712_s13  ;;  %v1397_v2 = vsel %vm816_vm4, %v1373_v20, %v4427_v53  ;;  %v584_v19 = vrot.slane %v582_v24, 1  ;;  %v554_v4 = vsel %vm494_vm2, %v549_v7, %v5160_v42  ;;  %v741_v0 = vor.u32 %v740_v31, %v736_v41  ;;  %v5162_v24 = vld [vmem:[#allocation13_spill] sm:$0xff]  ;;  %v5164_v53 = vld [vmem:[#allocation12_spill] sm:$0xff] }
  0xef   : > { %v1205_v33 = vpop.permute.xlu1 %1204  ;;  %v4503_v20 = vsel %vm494_vm2, %v753_v22, %v5162_v24  ;;  %v572_v31 = vrot.slane %v570_v45, 1 }
  0xf0   : > { %v1191_v15 = vpop.permute.xlu0 %1190 }
  0xf1   : > { %597 = vrot.lane.b32.xlu1 %v542_v52, %s3711_s10  ;;  %v568_v52 = vshrl.u32 %v4433_v59, 16  ;;  %v1375_v63 = vsel %vm799_vm3, %v5161_v9, %v1191_v15  ;;  %v1371_v59 = vsel %vm799_vm3, %v5164_v53, %v1187_v37  ;;  %v1496_v15 = vrot.slane %v1494_v3, 1  ;;  %v4517_v37 = vld [vmem:[%s5071_s2 + $0x28] sm:$0xff]  }
  0xf2   : > { %595 = vrot.lane.b32.xlu0 %v530_v60, %s3711_s10  ;;  %v5159_v60 = vld [vmem:[#allocation18_spill] sm:$0xff]  ;;  %v1396_v9 = vsel %vm816_vm4, %v1371_v59, %v1205_v33  ;;  %v585_v53 = vor.u32 %v584_v19, %v580_v30  ;;  %3431 = vmatprep.subr.bf16.mxu0 %v4517_v37 }
  0xf3   : > { %v1207_v1 = vpop.permute.xlu1 %1206  ;;  %v772_v48 = vshrl.u32 %v5159_v60, 16  ;;  %v774_v46 = vshll.u32 %v5159_v60, 16 }
  0xf4   : > { %v1341_v55 = vpop.permute.xlu0 %1340  ;;  %v1399_v41 = vsel %vm816_vm4, %v1375_v63, %v1207_v1  ;;  %v1492_v1 = vshrl.u32 %v1425_v26, 16  ;;  %v5166_v26 = vld [vmem:[#allocation17_spill] sm:$0xff] }
  0xf5   : > { %v1429_v39 = vsel %vm833_vm5, %v1397_v2, %v1341_v55  ;;  %789 = vrot.lane.b32.xlu1 %v4477_v47, %s3712_s13  ;;  %v5163_v2 = vld [vmem:[#allocation16_spill] sm:$0xff]  ;;  %v776_v33 = vrot.slane %v774_v46, 1  ;;  %v5167_v46 = vld [vmem:[#allocation15_spill] sm:$0xff] }
  0xf6   : > { %v1504_v57 = vshll.u32 %v1429_v39, 16  ;;  %787 = vrot.lane.b32.xlu0 %v4481_v6, %s3712_s13  ;;  %v760_v55 = vshrl.u32 %v5163_v2, 16  ;;  %v762_v42 = vshll.u32 %v5163_v2, 16  ;;  %v1502_v22 = vshrl.u32 %v1429_v39, 16 }
  0xf7   : > { %v1343_v7 = vpop.permute.xlu1 %1342  ;;  %v1497_v19 = vor.u32 %v1496_v15, %v1492_v1  ;;  %v1927_v1 = vshll.u32 %v4187_v34, 16 }
  0xf8   : > { %v1506_v38 = vrot.slane %v1504_v57, 1  ;;  %v1431_v29 = vsel %vm833_vm5, %v1399_v41, %v1343_v7  ;;  %v1339_v12 = vpop.permute.xlu0 %1338  ;;  %v5165_v57 = vld [vmem:[#allocation10_spill] sm:$0xff]  ;;  %v764_v30 = vrot.slane %v762_v42, 1  ;;  %v5168_v42 = vld [vmem:[#allocation20_spill] sm:$0xff] }
  0xf9   : > { %v1508_v24 = vshll.u32 %v1431_v29, 16  ;;  %v1427_v51 = vsel %vm833_vm5, %v1396_v9, %v1339_v12  ;;  %601 = vrot.lane.b32.xlu1 %v566_v43, %s3711_s10  ;;  %v4522_v59 = vsel %vm494_vm2, %v741_v0, %v5165_v57  ;;  %v573_v43 = vor.u32 %v572_v31, %v568_v52  ;;  %v5169_v9 = vld [vmem:[#allocation19_spill] sm:$0xff] }
  0xfa   : > { %v1498_v45 = vshll.u32 %v1427_v51, 16  ;;  %599 = vrot.lane.b32.xlu0 %v554_v4, %s3711_s10  ;;  %v1507_v29 = vor.u32 %v1506_v38, %v1502_v22  ;;  %v590_v4 = vsel %vm494_vm2, %v585_v53, %v5166_v26  ;;  %v777_v52 = vor.u32 %v776_v33, %v772_v48 }
  0xfb   : > { %v1510_v3 = vrot.slane %v1508_v24, 1  ;;  %v4524_v12 = vpop.permute.xlu1 %1860  ;;  %v578_v41 = vsel %vm494_vm2, %v573_v43, %v5167_v46  ;;  %v765_v7 = vor.u32 %v764_v30, %v760_v55  ;;  %v1939_v53 = vshll.u32 %v4193_v62, 16  ;;  %v5170_v46 = vld [vmem:[#allocation21_spill] sm:$0xff] }
  0xfc   : > { %v1500_v39 = vrot.slane %v1498_v45, 1  ;;  %v2247_v63 = vpop.permute.xlu0 %2246  ;;  %v4545_v15 = vsel %vm494_vm2, %v777_v52, %v5168_v42  ;;  %v1937_v43 = vshrl.u32 %v4193_v62, 16  ;;  %v1963_v62 = vshll.u32 %v4261_v35, 16 }
  0xfd   : > { %793 = vrot.lane.b32.xlu1 %v4503_v20, %s3712_s13  ;;  %v1511_v51 = vsel %vm494_vm2, %v1507_v29, %v1510_v3  ;;  %v4549_v22 = vsel %vm494_vm2, %v765_v7, %v5169_v9  ;;  %v2431_v55 = vsel %vm799_vm3, %v3837_v28, %v2247_v63  ;;  %v1941_v30 = vrot.slane %v1939_v53, 1 }
  0xfe   : > { %791 = vrot.lane.b32.xlu0 %v4522_v59, %s3712_s13  ;;  %v1501_v38 = vsel %vm494_vm2, %v1497_v19, %v1500_v39  ;;  %v2462_v57 = vsel %vm816_vm4, %v2431_v55, %v4524_v12  ;;  %v1925_v19 = vshrl.u32 %v4187_v34, 16  ;;  %v1929_v39 = vrot.slane %v1927_v1, 1 }
  0xff   : > { %3427 = vmatprep.mubr.msk.bf16.mxu1 %vm866_vm6, %v1501_v38  ;;  %v4536_v0 = vpop.permute.xlu1 %1862  ;;  %v1951_v7 = vshll.u32 %v4241_v58, 16 }
 0x100   : > { %v2251_v31 = vpop.permute.xlu0 %2250  ;;  %3428 = vmatmul.mubr.msk.bf16.gmra.mxu1 %vm866_vm6, %v1511_v51  ;;  %v1930_v55 = vor.u32 %v1929_v39, %v1925_v19 }
 0x101   : > { %605 = vrot.lane.b32.xlu1 %v590_v4, %s3711_s10  ;;  %v2435_v29 = vsel %vm799_vm3, %v3835_v25, %v2251_v31  ;;  %v1949_v4 = vshrl.u32 %v4241_v58, 16  ;;  %v3663_v31 = vld [vmem:[#allocation2 + $0x14] ss:$0 sps:$4 sm:$0x11]   ;;  %v1953_v39 = vrot.slane %v1951_v7, 1 }
 0x102   : > { %603 = vrot.lane.b32.xlu0 %v578_v41, %s3711_s10  ;;  %v2465_v38 = vsel %vm816_vm4, %v2435_v29, %v4536_v0  ;;  %v1942_v41 = vor.u32 %v1941_v30, %v1937_v43  ;;  %v1961_v29 = vshrl.u32 %v4261_v35, 16 }
 0x103   : > { %v2399_v48 = vpop.permute.xlu1 %2398 }
 0x104   : > { %v2249_v24 = vpop.permute.xlu0 %2248  ;;  %v2487_v3 = vsel %vm833_vm5, %v2462_v57, %v2399_v48 }
 0x105   : > { %797 = vrot.lane.b32.xlu1 %v4545_v15, %s3712_s13  ;;  %v2520_v51 = vshll.u32 %v2487_v3, 16  ;;  %v2433_v42 = vsel %vm799_vm3, %v3663_v31, %v2249_v24  ;;  %v1965_v24 = vrot.slane %v1963_v62, 1  ;;  %v2518_v30 = vshrl.u32 %v2487_v3, 16 }
 0x106   : > { %795 = vrot.lane.b32.xlu0 %v4549_v22, %s3712_s13  ;;  %v1954_v31 = vor.u32 %v1953_v39, %v1949_v4 }
 0x107   : > { %v2279_v45 = vpop.permute.xlu1 %2278 }
 0x108   : > { %v2253_v33 = vpop.permute.xlu0 %2252  ;;  %v2464_v53 = vsel %vm816_vm4, %v2433_v42, %v2279_v45  ;;  %v5171_v45 = vld [vmem:[#allocation24_spill] sm:$0xff]  ;;  %v1959_v4 = vsel %vm494_vm2, %v1954_v31, %v4265_v27 }
 0x109   : > { %1806 = vrot.lane.b32.xlu1 %v4438_v56, %s3711_s10  ;;  %v3662_v56 = vld [vmem:[#allocation2 + $0x20] ss:$0 sps:$4 sm:$0x11]   ;;  %v1947_v19 = vsel %vm494_vm2, %v1942_v41, %v5171_v45  ;;  %v1975_v41 = vshll.u32 %v4329_v16, 16 }
 0x10a   : > { %1804 = vrot.lane.b32.xlu0 %v4447_v61, %s3711_s10  ;;  %v2437_v61 = vsel %vm799_vm3, %v3662_v56, %v2253_v33 }
 0x10b   : > { %v2281_v63 = vpop.permute.xlu1 %2280 }
 0x10c   : > { %v2403_v26 = vpop.permute.xlu0 %2402  ;;  %v2467_v48 = vsel %vm816_vm4, %v2437_v61, %v2281_v63 }
 0x10d   : > { %v2491_v52 = vsel %vm833_vm5, %v2465_v38, %v2403_v26  ;;  %1998 = vrot.lane.b32.xlu1 %v4155_v10, %s3712_s13  ;;  %v2522_v10 = vrot.slane %v2520_v51, 1 }
 0x10e   : > { %v2530_v34 = vshll.u32 %v2491_v52, 16  ;;  %1996 = vrot.lane.b32.xlu0 %v5170_v46, %s3712_s13  ;;  %v2528_v38 = vshrl.u32 %v2491_v52, 16  ;;  %v5172_v52 = vld [vmem:[#allocation23_spill] sm:$0xff]  ;;  %v1966_v46 = vor.u32 %v1965_v24, %v1961_v29 }
 0x10f   : > { %v2405_v9 = vpop.permute.xlu1 %2404  ;;  %v1935_v56 = vsel %vm494_vm2, %v1930_v55, %v5172_v52  ;;  %v2523_v61 = vor.u32 %v2522_v10, %v2518_v30  ;;  %v1973_v10 = vshrl.u32 %v4329_v16, 16 }
 0x110   : > { %v2532_v1 = vrot.slane %v2530_v34, 1  ;;  %v2493_v57 = vsel %vm833_vm5, %v2467_v48, %v2405_v9  ;;  %v2401_v33 = vpop.permute.xlu0 %2400  ;;  %v1985_v48 = vshrl.u32 %v4343_v44, 16  ;;  %v1971_v55 = vsel %vm494_vm2, %v1966_v46, %v4298_v49 }
 0x111   : > { %v2534_v43 = vshll.u32 %v2493_v57, 16  ;;  %v2489_v58 = vsel %vm833_vm5, %v2464_v53, %v2401_v33  ;;  %1810 = vrot.lane.b32.xlu1 %v4477_v47, %s3711_s10  ;;  %v1977_v53 = vrot.slane %v1975_v41, 1 }
 0x112   : > { %v2524_v63 = vshll.u32 %v2489_v58, 16  ;;  %1808 = vrot.lane.b32.xlu0 %v4481_v6, %s3711_s10  ;;  %v2533_v51 = vor.u32 %v2532_v1, %v2528_v38  ;;  %v1987_v6 = vshll.u32 %v4343_v44, 16 }
 0x113   : > { %v2536_v26 = vrot.slane %v2534_v43, 1  ;;  %v4593_v35 = vpop.permute.xlu1 %1864  ;;  %v1978_v33 = vor.u32 %v1977_v53, %v1973_v10 }
 0x114   : > { %v2526_v34 = vrot.slane %v2524_v63, 1  ;;  %v2255_v47 = vpop.permute.xlu0 %2254  ;;  %v1989_v9 = vrot.slane %v1987_v6, 1 }
 0x115   : > { %v2537_v3 = vsel %vm494_vm2, %v2533_v51, %v2536_v26  ;;  %2002 = vrot.lane.b32.xlu1 %v1947_v19, %s3712_s13  ;;  %v1983_v58 = vsel %vm494_vm2, %v1978_v33, %v4347_v14 }
 0x116   : > { %2000 = vrot.lane.b32.xlu0 %v1935_v56, %s3712_s13  ;;  %v2527_v62 = vsel %vm494_vm2, %v2523_v61, %v2526_v34  ;;  %v1990_v44 = vor.u32 %v1989_v9, %v1985_v48 }
 0x117   : > { %3455 = vmatprep.mubr.msk.bf16.mxu1 %vm866_vm6, %v2527_v62  ;;  %v4604_v7 = vpop.permute.xlu1 %1866 }
 0x118   : > { %v2259_v42 = vpop.permute.xlu0 %2258  ;;  %3456 = vmatmul.mubr.msk.bf16.vlgmr.msra.gmra.mxu1 %vm866_vm6, %v2537_v3  ;;  %v1995_v38 = vsel %vm494_vm2, %v1990_v44, %v4379_v8  ;;  %v3665_v8 = vld [vmem:[#allocation2 + $0x2c] ss:$0 sps:$4 sm:$0x11]  }
 0x119   : > { %1814 = vrot.lane.b32.xlu1 %v4503_v20, %s3711_s10  ;;  %v2439_v20 = vsel %vm799_vm3, %v3868_v50, %v2255_v47  ;;  %v2443_v29 = vsel %vm799_vm3, %v3901_v18, %v2259_v42 }
 0x11a   : > { %1812 = vrot.lane.b32.xlu0 %v4522_v59, %s3711_s10  ;;  %v2468_v49 = vsel %vm816_vm4, %v2439_v20, %v4593_v35  ;;  %v2471_v30 = vsel %vm816_vm4, %v2443_v29, %v4604_v7 }
 0x11b   : > { %v2407_v1 = vpop.permute.xlu1 %2406 }
 0x11c   : > { %v2257_v57 = vpop.permute.xlu0 %2256  ;;  %v2495_v27 = vsel %vm833_vm5, %v2468_v49, %v2407_v1 }
 0x11d   : > { %2006 = vrot.lane.b32.xlu1 %v1971_v55, %s3712_s13  ;;  %v2540_v24 = vshll.u32 %v2495_v27, 16  ;;  %v2441_v39 = vsel %vm799_vm3, %v3665_v8, %v2257_v57  ;;  %v2538_v62 = vshrl.u32 %v2495_v27, 16 }
 0x11e   : > { %2004 = vrot.lane.b32.xlu0 %v1959_v4, %s3712_s13 }
 0x11f   : > { %v2283_v59 = vpop.permute.xlu1 %2282  ;;  %v2542_v26 = vrot.slane %v2540_v24, 1 }
 0x120   : > { %v2261_v16 = vpop.permute.xlu0 %2260  ;;  %v2470_v52 = vsel %vm816_vm4, %v2441_v39, %v2283_v59 }
 0x121   : > { %1818 = vrot.lane.b32.xlu1 %v4545_v15, %s3711_s10  ;;  %v3664_v15 = vld [vmem:[#allocation2 + $0x38] ss:$0 sps:$4 sm:$0x11]   ;;  %v2543_v48 = vor.u32 %v2542_v26, %v2538_v62 }
 0x122   : > { %1816 = vrot.lane.b32.xlu0 %v4549_v22, %s3711_s10  ;;  %v2445_v19 = vsel %vm799_vm3, %v3664_v15, %v2261_v16  ;;  %v3667_v15 = vld [vmem:[#allocation2 + $0x44] ss:$0 sps:$4 sm:$0x11]  }
 0x123   : > { %v2285_v43 = vpop.permute.xlu1 %2284 }
 0x124   : > { %v2411_v63 = vpop.permute.xlu0 %2410  ;;  %v2473_v14 = vsel %vm816_vm4, %v2445_v19, %v2285_v43 }
 0x125   : > { %v2499_v45 = vsel %vm833_vm5, %v2471_v30, %v2411_v63  ;;  %2010 = vrot.lane.b32.xlu1 %v1995_v38, %s3712_s13  ;;  %v3666_v30 = vld [vmem:[#allocation2 + $0x50] ss:$0 sps:$4 sm:$0x11]  }
 0x126   : > { %v2550_v22 = vshll.u32 %v2499_v45, 16  ;;  %2008 = vrot.lane.b32.xlu0 %v1983_v58, %s3712_s13  ;;  %v2548_v47 = vshrl.u32 %v2499_v45, 16 }
 0x127   : > { %v2413_v51 = vpop.permute.xlu1 %2412 }
 0x128   : > { %v2552_v56 = vrot.slane %v2550_v22, 1  ;;  %v2501_v61 = vsel %vm833_vm5, %v2473_v14, %v2413_v51  ;;  %v2409_v34 = vpop.permute.xlu0 %2408 }
 0x129   : > { %v2554_v3 = vshll.u32 %v2501_v61, 16  ;;  %v2497_v6 = vsel %vm833_vm5, %v2470_v52, %v2409_v34 }
 0x12a   : > { %v2544_v46 = vshll.u32 %v2497_v6, 16  ;;  %v2553_v41 = vor.u32 %v2552_v56, %v2548_v47 }
 0x12b   : > { %v2556_v31 = vrot.slane %v2554_v3, 1  ;;  %v4645_v42 = vpop.permute.xlu1 %1868 }
 0x12c   : > { %v2546_v9 = vrot.slane %v2544_v46, 1  ;;  %v2263_v55 = vpop.permute.xlu0 %2262 }
 0x12d   : > { %v2557_v10 = vsel %vm494_vm2, %v2553_v41, %v2556_v31  ;;  %v2447_v44 = vsel %vm799_vm3, %v5154_v54, %v2263_v55 }
 0x12e   : > { %v2547_v53 = vsel %vm494_vm2, %v2543_v48, %v2546_v9  ;;  %v2474_v33 = vsel %vm816_vm4, %v2447_v44, %v4645_v42 }
 0x12f   : > { %3459 = vmatprep.mubr.msk.bf16.mxu1 %vm866_vm6, %v2547_v53  ;;  %v4650_v1 = vpop.permute.xlu1 %1870 }
 0x130   : > { %v2267_v4 = vpop.permute.xlu0 %2266  ;;  %3460 = vmatmul.mubr.msk.bf16.gmra.mxu1 %vm866_vm6, %v2557_v10 }
 0x131   : > { %v2451_v16 = vsel %vm799_vm3, %v4033_v21, %v2267_v4 }
 0x132   : > { %v2477_v43 = vsel %vm816_vm4, %v2451_v16, %v4650_v1 }
 0x133   : > { %v2415_v57 = vpop.permute.xlu1 %2414 }
 0x134   : > { %v2265_v20 = vpop.permute.xlu0 %2264  ;;  %v2503_v29 = vsel %vm833_vm5, %v2474_v33, %v2415_v57 }
 0x135   : > { %v2560_v38 = vshll.u32 %v2503_v29, 16  ;;  %v2449_v19 = vsel %vm799_vm3, %v3667_v15, %v2265_v20  ;;  %v2558_v47 = vshrl.u32 %v2503_v29, 16 }
 0x137   : > { %v2287_v59 = vpop.permute.xlu1 %2286  ;;  %v2562_v39 = vrot.slane %v2560_v38, 1 }
 0x138   : > { %v2269_v49 = vpop.permute.xlu0 %2268  ;;  %v2476_v14 = vsel %vm816_vm4, %v2449_v19, %v2287_v59 }
 0x139   : > { %v2453_v63 = vsel %vm799_vm3, %v3666_v30, %v2269_v49  ;;  %v2563_v41 = vor.u32 %v2562_v39, %v2558_v47 }
 0x13b   : > { %v2289_v27 = vpop.permute.xlu1 %2288 }
 0x13c   : > { %v2419_v58 = vpop.permute.xlu0 %2418  ;;  %v2479_v22 = vsel %vm816_vm4, %v2453_v63, %v2289_v27 }
 0x13d   : > { %v2507_v24 = vsel %vm833_vm5, %v2477_v43, %v2419_v58 }
 0x13e   : > { %v2570_v45 = vshll.u32 %v2507_v24, 16  ;;  %v2568_v56 = vshrl.u32 %v2507_v24, 16  ;;  %v3668_v24 = vld [vmem:[#allocation2 + $0x68] ss:$0 sps:$4 sm:$0x11]  }
 0x13f   : > { %v2421_v8 = vpop.permute.xlu1 %2420 }
 0x140   : > { %v2572_v51 = vrot.slane %v2570_v45, 1  ;;  %v2509_v26 = vsel %vm833_vm5, %v2479_v22, %v2421_v8  ;;  %v2417_v52 = vpop.permute.xlu0 %2416  ;;  %v3669_v45 = vld [vmem:[#allocation2 + $0x5c] ss:$0 sps:$4 sm:$0x11]  }
 0x141   : > { %v2574_v61 = vshll.u32 %v2509_v26, 16  ;;  %v2505_v34 = vsel %vm833_vm5, %v2476_v14, %v2417_v52 }
 0x142   : > { %v2564_v3 = vshll.u32 %v2505_v34, 16  ;;  %v2573_v6 = vor.u32 %v2572_v51, %v2568_v56 }
 0x143   : > { %v2576_v62 = vrot.slane %v2574_v61, 1  ;;  %v4669_v46 = vpop.permute.xlu1 %1872 }
 0x144   : > { %v2566_v31 = vrot.slane %v2564_v3, 1  ;;  %v2271_v48 = vpop.permute.xlu0 %2270 }
 0x145   : > { %v2577_v9 = vsel %vm494_vm2, %v2573_v6, %v2576_v62  ;;  %v2455_v20 = vsel %vm799_vm3, %v5163_v2, %v2271_v48 }
 0x146   : > { %v2567_v55 = vsel %vm494_vm2, %v2563_v41, %v2566_v31  ;;  %v2480_v59 = vsel %vm816_vm4, %v2455_v20, %v4669_v46 }
 0x147   : > { %3463 = vmatprep.mubr.msk.bf16.mxu1 %vm866_vm6, %v2567_v55  ;;  %v4674_v10 = vpop.permute.xlu1 %1874 }
 0x148   : > { %v2275_v53 = vpop.permute.xlu0 %2274  ;;  %3464 = vmatmul.mubr.msk.bf16.gmra.mxu1 %vm866_vm6, %v2577_v9 }
 0x149   : > { %v2459_v49 = vsel %vm799_vm3, %v5159_v60, %v2275_v53 }
 0x14a   : > { %v2483_v38 = vsel %vm816_vm4, %v2459_v49, %v4674_v10  ;;  %v3661_v49 = vld [vmem:[%s5071_s2 + $0x20] sm:$0xff]  }
 0x14b   : > { %v2423_v4 = vpop.permute.xlu1 %2422 }
 0x14c   : > { %v2273_v57 = vpop.permute.xlu0 %2272  ;;  %v2511_v16 = vsel %vm833_vm5, %v2480_v59, %v2423_v4 }
 0x14d   : > { %v2580_v27 = vshll.u32 %v2511_v16, 16  ;;  %v2457_v15 = vsel %vm799_vm3, %v3669_v45, %v2273_v57  ;;  %v2578_v34 = vshrl.u32 %v2511_v16, 16  ;;  %v5173_v57 = vld [vmem:[#allocation22_spill] sm:$0xff] }
 0x14f   : > { %v2291_v44 = vpop.permute.xlu1 %2290  ;;  %v2582_v8 = vrot.slane %v2580_v27, 1 }
 0x150   : > { %v2277_v33 = vpop.permute.xlu0 %2276  ;;  %v2482_v39 = vsel %vm816_vm4, %v2457_v15, %v2291_v44  ;;  %v5175_v15 = vld [vmem:[#allocation26_spill] sm:$0xff] }
 0x151   : > { %v2461_v30 = vsel %vm799_vm3, %v3668_v24, %v2277_v33  ;;  %v2583_v41 = vor.u32 %v2582_v8, %v2578_v34  ;;  %v5176_v8 = vld [vmem:[#allocation25_spill] sm:$0xff] }
 0x153   : > { %v2293_v29 = vpop.permute.xlu1 %2292 }
 0x154   : > { %v2427_v43 = vpop.permute.xlu0 %2426  ;;  %v2485_v19 = vsel %vm816_vm4, %v2461_v30, %v2293_v29 }
 0x155   : > { %v2515_v58 = vsel %vm833_vm5, %v2483_v38, %v2427_v43 }
 0x156   : > { %v2590_v63 = vshll.u32 %v2515_v58, 16  ;;  %v2588_v52 = vshrl.u32 %v2515_v58, 16 }
 0x157   : > { %v2429_v22 = vpop.permute.xlu1 %2428 }
 0x158   : > { %v2592_v14 = vrot.slane %v2590_v63, 1  ;;  %v2517_v51 = vsel %vm833_vm5, %v2485_v19, %v2429_v22  ;;  %v2425_v26 = vpop.permute.xlu0 %2424 }
 0x159   : > { %v2594_v56 = vshll.u32 %v2517_v51, 16  ;;  %v2513_v61 = vsel %vm833_vm5, %v2482_v39, %v2425_v26  ;;  %v5177_v26 = vld [vmem:[#allocation11_spill] sm:$0xff] }
 0x15a   : > { %v2584_v47 = vshll.u32 %v2513_v61, 16  ;;  %v2593_v3 = vor.u32 %v2592_v14, %v2588_v52  ;;  %v5178_v61 = vld [vmem:[#allocation30_spill] sm:$0xff] }
 0x15b   : > { %v2596_v6 = vrot.slane %v2594_v56, 1  ;;  %v594_v62 = vpop.permute.xlu1 %593 }
 0x15c   : > { %v2586_v31 = vrot.slane %v2584_v47, 1  ;;  %v803_v48 = vsel %vm799_vm3, %v4226_v13, %v594_v62  ;;  %v592_v9 = vpop.permute.xlu0 %591  ;;  %v5179_v47 = vld [vmem:[#allocation29_spill] sm:$0xff] }
 0x15d   : > { %v801_v55 = vsel %vm799_vm3, %v4223_v23, %v592_v9  ;;  %v2597_v53 = vsel %vm494_vm2, %v2593_v3, %v2596_v6  ;;  %v820_v20 = vsel %vm816_vm4, %v803_v48, %v5173_v57 }
 0x15e   : > { %v2587_v4 = vsel %vm494_vm2, %v2583_v41, %v2586_v31  ;;  %v818_v13 = vsel %vm816_vm4, %v801_v55, %v4184_v5  ;;  %v5180_v41 = vld [vmem:[#allocation28_spill] sm:$0xff] }
 0x15f   : > { %3467 = vmatprep.mubr.msk.bf16.mxu1 %vm866_vm6, %v2587_v4  ;;  %v786_v44 = vpop.permute.xlu1 %785 }
 0x160   : > { %v837_v59 = vsel %vm833_vm5, %v820_v20, %v786_v44  ;;  %3468 = vmatmul.mubr.msk.bf16.gmra.mxu1 %vm866_vm6, %v2597_v53  ;;  %v784_v33 = vpop.permute.xlu0 %783 }
 0x161   : > { %v835_v23 = vsel %vm833_vm5, %v818_v13, %v784_v33 }
 0x162   : > { %3395 = vmatprep.mubr.msk.bf16.mxu0 %vm866_vm6, %v835_v23 }
 0x163   : > { %3396 = vmatmul.mubr.msk.bf16.vlgmr.msra.gmra.mxu0 %vm866_vm6, %v837_v59  ;;  %v598_v16 = vpop.permute.xlu1 %597  ;;  %v4758_v59 = vld [vmem:[%s5072_s3] ss:$0 sm:$0xff] }
 0x164   : > { %v807_v29 = vsel %vm799_vm3, %v4272_v40, %v598_v16  ;;  %v596_v27 = vpop.permute.xlu0 %595  ;;  %3432 = vmatpush3.bf16.msra.mxu0 %v4517_v37 }
 0x165   : > { %v805_v5 = vsel %vm799_vm3, %v4256_v17, %v596_v27  ;;  %3433 = vmatprep.subr.bf16.mxu0 %v3661_v49  ;;  %v824_v38 = vsel %vm816_vm4, %v807_v29, %v4218_v32  ;;  %v5174_v32 = vld [vmem:[#allocation27_spill] sm:$0xff] }
 0x166   : > { %v822_v24 = vsel %vm816_vm4, %v805_v5, %v4205_v36 }
 0x167   : > { %v790_v43 = vpop.permute.xlu1 %789 }
 0x168   : > { %v841_v58 = vsel %vm833_vm5, %v824_v38, %v790_v43  ;;  %v788_v30 = vpop.permute.xlu0 %787  ;;  %3434 = vmatpush3.bf16.msra.mxu0 %v3661_v49 }
 0x169   : > { %v839_v40 = vsel %vm833_vm5, %v822_v24, %v788_v30 }
 0x16a   : > { %3399 = vmatprep.mubr.msk.bf16.mxu0 %vm866_vm6, %v839_v40 }
 0x16b   : > { %3400 = vmatmul.mubr.msk.bf16.gmra.mxu0 %vm866_vm6, %v841_v58  ;;  %v602_v37 = vpop.permute.xlu1 %601 }
 0x16c   : > { %v811_v17 = vsel %vm799_vm3, %v4354_v11, %v602_v37  ;;  %v600_v63 = vpop.permute.xlu0 %599 }
 0x16d   : > { %v809_v45 = vsel %vm799_vm3, %v5174_v32, %v600_v63  ;;  %v828_v19 = vsel %vm816_vm4, %v811_v17, %v5175_v15 }
 0x16e   : > { %v826_v39 = vsel %vm816_vm4, %v809_v45, %v5176_v8 }
 0x16f   : > { %v794_v36 = vpop.permute.xlu1 %793 }
 0x170   : > { %v845_v22 = vsel %vm833_vm5, %v828_v19, %v794_v36  ;;  %v792_v14 = vpop.permute.xlu0 %791 }
 0x171   : > { %v843_v51 = vsel %vm833_vm5, %v826_v39, %v792_v14 }
 0x172   : > { %3403 = vmatprep.mubr.msk.bf16.mxu0 %vm866_vm6, %v843_v51 }
 0x173   : > { %3404 = vmatmul.mubr.msk.bf16.gmra.mxu0 %vm866_vm6, %v845_v22  ;;  %v606_v11 = vpop.permute.xlu1 %605 }
 0x174   : > { %v815_v52 = vsel %vm799_vm3, %v5177_v26, %v606_v11  ;;  %v604_v56 = vpop.permute.xlu0 %603 }
 0x175   : > { %v813_v34 = vsel %vm799_vm3, %v5178_v61, %v604_v56  ;;  %v832_v3 = vsel %vm816_vm4, %v815_v52, %v5179_v47 }
 0x176   : > { %v830_v31 = vsel %vm816_vm4, %v813_v34, %v5180_v41 }
 0x177   : > { %v798_v6 = vpop.permute.xlu1 %797 }
 0x178   : > { %v849_v62 = vsel %vm833_vm5, %v832_v3, %v798_v6  ;;  %v796_v48 = vpop.permute.xlu0 %795 }
 0x179   : > { %v847_v9 = vsel %vm833_vm5, %v830_v31, %v796_v48 }
 0x17a   : > { %3407 = vmatprep.mubr.msk.bf16.mxu0 %vm866_vm6, %v847_v9 }
 0x17b   : > { %3408 = vmatmul.mubr.msk.bf16.gmra.mxu0 %vm866_vm6, %v849_v62  ;;  %v1807_v55 = vpop.permute.xlu1 %1806 }
 0x17c   : > { %v2015_v53 = vsel %vm799_vm3, %v3835_v25, %v1807_v55  ;;  %v1805_v4 = vpop.permute.xlu0 %1804 }
 0x17d   : > { %v2013_v57 = vsel %vm799_vm3, %v3837_v28, %v1805_v4  ;;  %v2031_v20 = vsel %vm816_vm4, %v2015_v53, %v4536_v0  ;;  %v4769_v0 = vld [vmem:[%s5073_s4] ss:$0 sm:$0xff] }
 0x17e   : > { %v2029_v13 = vsel %vm816_vm4, %v2013_v57, %v4524_v12 }
 0x17f   : > { %v1999_v44 = vpop.permute.xlu1 %1998 }
 0x180   : > { %v2047_v33 = vsel %vm833_vm5, %v2031_v20, %v1999_v44  ;;  %v1997_v23 = vpop.permute.xlu0 %1996 }
 0x181   : > { %v2045_v25 = vsel %vm833_vm5, %v2029_v13, %v1997_v23  ;;  %v3417_v49 = vpop.f32.mrf.mxu1 }
 0x182   : > { %v1652_v28 = vmul.f32 %v3417_v49, %v4758_v59  ;;  %3435 = vmatprep.mubr.msk.bf16.mxu0 %vm866_vm6, %v2045_v25 }
 0x183   : > { %3436 = vmatmul.mubr.msk.bf16.vlgmr.msra.gmra.mxu0 %vm866_vm6, %v2047_v33  ;;  %v1811_v16 = vpop.permute.xlu1 %1810  ;;  %v1587_v29 = vpop.f32.mrf.mxu1 }
 0x184   : > { %v2019_v12 = vsel %vm799_vm3, %v3901_v18, %v1811_v16  ;;  %v1650_v27 = vmul.f32 %v4758_v59, %v1587_v29  ;;  %v1809_v5 = vpop.permute.xlu0 %1808  ;;  %v1668_v58 = vadd.f32 %v4769_v0, %v1652_v28 }
 0x185   : > { %v2017_v38 = vsel %vm799_vm3, %v3868_v50, %v1809_v5  ;;  %v3418_v43 = vpop.f32.mrf.mxu1  ;;  %v2035_v40 = vsel %vm816_vm4, %v2019_v12, %v4604_v7 }
 0x186   : > { %v1653_v24 = vmul.f32 %v3418_v43, %v4758_v59  ;;  %v1666_v30 = vadd.f32 %v4769_v0, %v1650_v27  ;;  %v2033_v50 = vsel %vm816_vm4, %v2017_v38, %v4593_v35  ;;  %v1684_v19 = vmax.f32 %v1668_v58, 0.0 }
 0x187   : > { %v2003_v37 = vpop.permute.xlu1 %2002  ;;  %v1590_v17 = vpop.f32.mrf.mxu1 }
 0x188   : > { %v1669_v18 = vadd.f32 %v4769_v0, %v1653_v24  ;;  %v2051_v63 = vsel %vm833_vm5, %v2035_v40, %v2003_v37  ;;  %v1651_v32 = vmul.f32 %v4758_v59, %v1590_v17  ;;  %v2001_v45 = vpop.permute.xlu0 %2000  ;;  %v1682_v8 = vmax.f32 %v1666_v30, 0.0 }
 0x189   : > { %v2049_v15 = vsel %vm833_vm5, %v2033_v50, %v2001_v45 }
 0x18a   : > { %v1685_v36 = vmax.f32 %v1669_v18, 0.0  ;;  %v1667_v22 = vadd.f32 %v4769_v0, %v1651_v32  ;;  %3439 = vmatprep.mubr.msk.bf16.mxu0 %vm866_vm6, %v2049_v15 }
 0x18b   : > { %3440 = vmatmul.mubr.msk.bf16.gmra.mxu0 %vm866_vm6, %v2051_v63  ;;  %v1815_v7 = vpop.permute.xlu1 %1814 }
 0x18c   : > { %v3518_v39 = vpack.i.bf16 %v1685_v36, %v1684_v19  ;;  %v1683_v14 = vmax.f32 %v1667_v22, 0.0  ;;  %v2023_v51 = vsel %vm799_vm3, %v4033_v21, %v1815_v7  ;;  %v1813_v11 = vpop.permute.xlu0 %1812 }
 0x18d   : > { %v2021_v35 = vsel %vm799_vm3, %v5154_v54, %v1813_v11  ;;  %v2039_v52 = vsel %vm816_vm4, %v2023_v51, %v4650_v1 }
 0x18e   : > { %v3523_v26 = vpack.i.bf16 %v1683_v14, %v1682_v8  ;;  %3519 = vrot.lane.b32.xlu1 %v3518_v39, %s3713_s29  ;;  %v2037_v47 = vsel %vm816_vm4, %v2021_v35, %v4645_v42 }
 0x18f   : > { %v2007_v56 = vpop.permute.xlu1 %2006 }
 0x190   : > { %v2055_v61 = vsel %vm833_vm5, %v2039_v52, %v2007_v56  ;;  %v3421_v34 = vpop.f32.mrf.mxu1  ;;  %v2005_v3 = vpop.permute.xlu0 %2004  ;;  %3524 = vrot.lane.b32.xlu0 %v3523_v26, %s3713_s29 }
 0x191   : > { %v1656_v21 = vmul.f32 %v3421_v34, %v4758_v59  ;;  %v2053_v54 = vsel %vm833_vm5, %v2037_v47, %v2005_v3 }
 0x192   : > { %v1603_v6 = vpop.f32.mrf.mxu1  ;;  %3443 = vmatprep.mubr.msk.bf16.mxu0 %vm866_vm6, %v2053_v54 }
 0x193   : > { %v1654_v62 = vmul.f32 %v4758_v59, %v1603_v6  ;;  %3444 = vmatmul.mubr.msk.bf16.gmra.mxu0 %vm866_vm6, %v2055_v61  ;;  %v1819_v1 = vpop.permute.xlu1 %1818  ;;  %v1672_v48 = vadd.f32 %v4769_v0, %v1656_v21 }
 0x194   : > { %v2027_v41 = vsel %vm799_vm3, %v5159_v60, %v1819_v1  ;;  %v3422_v31 = vpop.f32.mrf.mxu1  ;;  %v1817_v42 = vpop.permute.xlu0 %1816 }
 0x195   : > { %v1657_v9 = vmul.f32 %v3422_v31, %v4758_v59  ;;  %v2025_v55 = vsel %vm799_vm3, %v5163_v2, %v1817_v42  ;;  %v1670_v4 = vadd.f32 %v4769_v0, %v1654_v62  ;;  %v2043_v44 = vsel %vm816_vm4, %v2027_v41, %v4674_v10 }
 0x196   : > { %v1606_v53 = vpop.f32.mrf.mxu1  ;;  %v2041_v13 = vsel %vm816_vm4, %v2025_v55, %v4669_v46  ;;  %v1688_v25 = vmax.f32 %v1672_v48, 0.0 }
 0x197   : > { %v1673_v57 = vadd.f32 %v4769_v0, %v1657_v9  ;;  %v1655_v20 = vmul.f32 %v4758_v59, %v1606_v53  ;;  %v2011_v60 = vpop.permute.xlu1 %2010  ;;  %v1686_v16 = vmax.f32 %v1670_v4, 0.0 }
 0x198   : > { %v2059_v33 = vsel %vm833_vm5, %v2043_v44, %v2011_v60  ;;  %v2009_v23 = vpop.permute.xlu0 %2008 }
 0x199   : > { %v1689_v49 = vmax.f32 %v1673_v57, 0.0  ;;  %v1671_v2 = vadd.f32 %v4769_v0, %v1655_v20  ;;  %v2057_v28 = vsel %vm833_vm5, %v2041_v13, %v2009_v23 }
 0x19a   : > { %3447 = vmatprep.mubr.msk.bf16.mxu0 %vm866_vm6, %v2057_v28 }
 0x19b   : > { %v3528_v29 = vpack.i.bf16 %v1689_v49, %v1688_v25  ;;  %v1687_v12 = vmax.f32 %v1671_v2, 0.0  ;;  %3448 = vmatmul.mubr.msk.bf16.gmra.mxu0 %vm866_vm6, %v2059_v33 }
 0x19d   : > { %v3533_v10 = vpack.i.bf16 %v1687_v12, %v1686_v16  ;;  %3529 = vrot.lane.b32.xlu1 %v3528_v29, %s3713_s29 }
 0x19f   : > { %3534 = vrot.lane.b32.xlu0 %v3533_v10, %s3713_s29 }
 0x1a8   : > { %v3425_v46 = vpop.f32.mrf.mxu1 }
 0x1a9   : > { %v1660_v27 = vmul.f32 %v3425_v46, %v4758_v59 }
 0x1aa   : > { %v1619_v5 = vpop.f32.mrf.mxu1 }
 0x1ab   : > { %v1658_v38 = vmul.f32 %v4758_v59, %v1619_v5  ;;  %v1676_v58 = vadd.f32 %v4769_v0, %v1660_v27 }
 0x1ac   : > { %v3426_v43 = vpop.f32.mrf.mxu1 }
 0x1ad   : > { %v1661_v24 = vmul.f32 %v3426_v43, %v4758_v59  ;;  %v1674_v40 = vadd.f32 %v4769_v0, %v1658_v38  ;;  %v1692_v18 = vmax.f32 %v1676_v58, 0.0 }
 0x1ae   : > { %v1622_v30 = vpop.f32.mrf.mxu1 }
 0x1af   : > { %v1677_v37 = vadd.f32 %v4769_v0, %v1661_v24  ;;  %v1659_v17 = vmul.f32 %v4758_v59, %v1622_v30  ;;  %v1690_v50 = vmax.f32 %v1674_v40, 0.0 }
 0x1b1   : > { %v1693_v63 = vmax.f32 %v1677_v37, 0.0  ;;  %v1675_v32 = vadd.f32 %v4769_v0, %v1659_v17 }
 0x1b3   : > { %v3538_v45 = vpack.i.bf16 %v1693_v63, %v1692_v18  ;;  %v1691_v15 = vmax.f32 %v1675_v32, 0.0 }
 0x1b5   : > { %v3543_v19 = vpack.i.bf16 %v1691_v15, %v1690_v50  ;;  %3539 = vrot.lane.b32.xlu1 %v3538_v45, %s3713_s29 }
 0x1b7   : > { %3544 = vrot.lane.b32.xlu0 %v3543_v19, %s3713_s29 }
 0x1c0   : > { %v3429_v36 = vpop.f32.mrf.mxu1 }
 0x1c1   : > { %v1664_v22 = vmul.f32 %v3429_v36, %v4758_v59 }
 0x1c2   : > { %v1635_v7 = vpop.f32.mrf.mxu1 }
 0x1c3   : > { %v1662_v8 = vmul.f32 %v4758_v59, %v1635_v7  ;;  %v1680_v14 = vadd.f32 %v4769_v0, %v1664_v22 }
 0x1c4   : > { %v3430_v39 = vpop.f32.mrf.mxu1 }
 0x1c5   : > { %v1665_v51 = vmul.f32 %v3430_v39, %v4758_v59  ;;  %v1678_v35 = vadd.f32 %v4769_v0, %v1662_v8  ;;  %v1696_v56 = vmax.f32 %v1680_v14, 0.0 }
 0x1c6   : > { %v1638_v11 = vpop.f32.mrf.mxu1 }
 0x1c7   : > { %v1681_v26 = vadd.f32 %v4769_v0, %v1665_v51  ;;  %v1663_v52 = vmul.f32 %v4758_v59, %v1638_v11  ;;  %v1694_v47 = vmax.f32 %v1678_v35, 0.0 }
 0x1c9   : > { %v1697_v61 = vmax.f32 %v1681_v26, 0.0  ;;  %v1679_v34 = vadd.f32 %v4769_v0, %v1663_v52 }
 0x1cb   : > { %v3548_v3 = vpack.i.bf16 %v1697_v61, %v1696_v56  ;;  %v1695_v21 = vmax.f32 %v1679_v34, 0.0 }
 0x1cd   : > { %v3553_v54 = vpack.i.bf16 %v1695_v21, %v1694_v47  ;;  %3549 = vrot.lane.b32.xlu1 %v3548_v3, %s3713_s29 }
 0x1cf   : > { %3554 = vrot.lane.b32.xlu0 %v3553_v54, %s3713_s29 }
 0x1d8   : > { %v3457_v6 = vpop.f32.mrf.mxu1 }
 0x1d9   : > { %v2738_v62 = vmul.f32 %v3457_v6, %v4758_v59 }
 0x1da   : > { %v2673_v1 = vpop.f32.mrf.mxu1 }
 0x1db   : > { %v2736_v41 = vmul.f32 %v4758_v59, %v2673_v1  ;;  %v2754_v42 = vadd.f32 %v4769_v0, %v2738_v62 }
 0x1dc   : > { %v3458_v31 = vpop.f32.mrf.mxu1 }
 0x1dd   : > { %v2739_v48 = vmul.f32 %v3458_v31, %v4758_v59  ;;  %v2752_v55 = vadd.f32 %v4769_v0, %v2736_v41  ;;  %v2770_v57 = vmax.f32 %v2754_v42, 0.0 }
 0x1de   : > { %v2676_v9 = vpop.f32.mrf.mxu1 }
 0x1df   : > { %v2755_v53 = vadd.f32 %v4769_v0, %v2739_v48  ;;  %v2737_v4 = vmul.f32 %v4758_v59, %v2676_v9  ;;  %v2768_v60 = vmax.f32 %v2752_v55, 0.0 }
 0x1e1   : > { %v2771_v20 = vmax.f32 %v2755_v53, 0.0  ;;  %v2753_v44 = vadd.f32 %v4769_v0, %v2737_v4 }
 0x1e3   : > { %v3558_v33 = vpack.i.bf16 %v2771_v20, %v2770_v57  ;;  %v2769_v13 = vmax.f32 %v2753_v44, 0.0 }
 0x1e5   : > { %v3563_v23 = vpack.i.bf16 %v2769_v13, %v2768_v60  ;;  %3559 = vrot.lane.b32.xlu1 %v3558_v33, %s3713_s29 }
 0x1e7   : > { %3564 = vrot.lane.b32.xlu0 %v3563_v23, %s3713_s29 }
 0x1f0   : > { %v3461_v25 = vpop.f32.mrf.mxu1 }
 0x1f1   : > { %v2742_v49 = vmul.f32 %v3461_v25, %v4758_v59 }
 0x1f2   : > { %v2689_v2 = vpop.f32.mrf.mxu1 }
 0x1f3   : > { %v2740_v28 = vmul.f32 %v4758_v59, %v2689_v2  ;;  %v2758_v29 = vadd.f32 %v4769_v0, %v2742_v49 }
 0x1f4   : > { %v3462_v16 = vpop.f32.mrf.mxu1 }
 0x1f5   : > { %v2743_v12 = vmul.f32 %v3462_v16, %v4758_v59  ;;  %v2756_v46 = vadd.f32 %v4769_v0, %v2740_v28  ;;  %v2774_v38 = vmax.f32 %v2758_v29, 0.0 }
 0x1f6   : > { %v2692_v10 = vpop.f32.mrf.mxu1 }
 0x1f7   : > { %v2759_v27 = vadd.f32 %v4769_v0, %v2743_v12  ;;  %v2741_v5 = vmul.f32 %v4758_v59, %v2692_v10  ;;  %v2772_v24 = vmax.f32 %v2756_v46, 0.0 }
 0x1f9   : > { %v2775_v43 = vmax.f32 %v2759_v27, 0.0  ;;  %v2757_v58 = vadd.f32 %v4769_v0, %v2741_v5 }
 0x1fb   : > { %v3568_v30 = vpack.i.bf16 %v2775_v43, %v2774_v38  ;;  %v2773_v40 = vmax.f32 %v2757_v58, 0.0 }
 0x1fd   : > { %v3573_v37 = vpack.i.bf16 %v2773_v40, %v2772_v24  ;;  %3569 = vrot.lane.b32.xlu1 %v3568_v30, %s3713_s29 }
 0x1ff   : > { %3574 = vrot.lane.b32.xlu0 %v3573_v37, %s3713_s29 }
 0x200   : > { %v3520_v3 = vpop.permute.xlu1 %3519 }
 0x201   : > { %v3521_v57 = vunpack.i.l.bf16 %v3520_v3  ;;  %v3522_v30 = vunpack.i.h.bf16 %v3520_v3 }
 0x202   : > { %v3525_v6 = vpop.permute.xlu0 %3524 }
 0x203   : > { %v3526_v20 = vunpack.i.l.bf16 %v3525_v6 }
 0x208   : > { %v3465_v17 = vpop.f32.mrf.mxu1 }
 0x209   : > { %v2746_v18 = vmul.f32 %v3465_v17, %v4758_v59 }
 0x20a   : > { %v2705_v63 = vpop.f32.mrf.mxu1 }
 0x20b   : > { %v2744_v32 = vmul.f32 %v4758_v59, %v2705_v63  ;;  %v2762_v45 = vadd.f32 %v4769_v0, %v2746_v18  ;;  %v3527_v63 = vunpack.i.h.bf16 %v3525_v6 }
 0x20c   : > { %v3466_v50 = vpop.f32.mrf.mxu1 }
 0x20d   : > { %v2747_v15 = vmul.f32 %v3466_v50, %v4758_v59  ;;  %v2760_v36 = vadd.f32 %v4769_v0, %v2744_v32  ;;  %v2778_v8 = vmax.f32 %v2762_v45, 0.0 }
 0x20e   : > { %v2708_v19 = vpop.f32.mrf.mxu1 }
 0x20f   : > { %v2763_v22 = vadd.f32 %v4769_v0, %v2747_v15  ;;  %v2745_v7 = vmul.f32 %v4758_v59, %v2708_v19  ;;  %v2776_v51 = vmax.f32 %v2760_v36, 0.0  ;;  %v3530_v38 = vpop.permute.xlu1 %3529 }
 0x210   : > { %v3531_v15 = vunpack.i.l.bf16 %v3530_v38 }
 0x211   : > { %v2779_v39 = vmax.f32 %v2763_v22, 0.0  ;;  %v2761_v14 = vadd.f32 %v4769_v0, %v2745_v7  ;;  %v3535_v19 = vpop.permute.xlu0 %3534 }
 0x213   : > { %v3578_v11 = vpack.i.bf16 %v2779_v39, %v2778_v8  ;;  %v2777_v35 = vmax.f32 %v2761_v14, 0.0 }
 0x215   : > { %v3583_v26 = vpack.i.bf16 %v2777_v35, %v2776_v51  ;;  %3579 = vrot.lane.b32.xlu1 %v3578_v11, %s3713_s29 }
 0x217   : > { %3584 = vrot.lane.b32.xlu0 %v3583_v26, %s3713_s29  ;;  %v3536_v26 = vunpack.i.l.bf16 %v3535_v19 }
 0x220   : > { %v3469_v52 = vpop.f32.mrf.mxu1 }
 0x221   : > { %v2750_v56 = vmul.f32 %v3469_v52, %v4758_v59 }
 0x222   : > { %v2721_v61 = vpop.f32.mrf.mxu1 }
 0x223   : > { %v2748_v34 = vmul.f32 %v4758_v59, %v2721_v61  ;;  %v3397_v47 = vpop.f32.mrf.mxu0  ;;  %v2766_v62 = vadd.f32 %v4769_v0, %v2750_v56 }
 0x224   : > { %v988_v21 = vmul.f32 %v3397_v47, %v4758_v59  ;;  %v3470_v54 = vpop.f32.mrf.mxu1 }
 0x225   : > { %v2751_v1 = vmul.f32 %v3470_v54, %v4758_v59  ;;  %v917_v41 = vpop.f32.mrf.mxu0  ;;  %v2764_v31 = vadd.f32 %v4769_v0, %v2748_v34  ;;  %v2782_v33 = vmax.f32 %v2766_v62, 0.0 }
 0x226   : > { %v1010_v42 = vadd.f32 %v4769_v0, %v988_v21  ;;  %v986_v48 = vmul.f32 %v4758_v59, %v917_v41  ;;  %v2724_v9 = vpop.f32.mrf.mxu1 }
 0x227   : > { %v2767_v55 = vadd.f32 %v4769_v0, %v2751_v1  ;;  %v2749_v53 = vmul.f32 %v4758_v59, %v2724_v9  ;;  %v3398_v4 = vpop.f32.mrf.mxu0  ;;  %v2780_v2 = vmax.f32 %v2764_v31, 0.0  ;;  %v3540_v21 = vpop.permute.xlu1 %3539  ;;  %v3532_v1 = vunpack.i.h.bf16 %v3530_v38 }
 0x228   : > { %v1026_v44 = vmax.f32 %v1010_v42, 0.0  ;;  %v1008_v60 = vadd.f32 %v4769_v0, %v986_v48  ;;  %v989_v25 = vmul.f32 %v3398_v4, %v4758_v59  ;;  %v3537_v48 = vunpack.i.h.bf16 %v3535_v19 }
 0x229   : > { %v2783_v13 = vmax.f32 %v2767_v55, 0.0  ;;  %v2765_v23 = vadd.f32 %v4769_v0, %v2749_v53  ;;  %v920_v49 = vpop.f32.mrf.mxu0  ;;  %v3541_v4 = vunpack.i.l.bf16 %v3540_v21 }
 0x22a   : > { %v1765_v28 = vsel %vm1762_vm7, %v1026_v44, %v3521_v57  ;;  %v1024_v16 = vmax.f32 %v1008_v60, 0.0  ;;  %v987_v29 = vmul.f32 %v4758_v59, %v920_v49  ;;  %v1011_v27 = vadd.f32 %v4769_v0, %v989_v25  ;;  %v3545_v57 = vpop.permute.xlu0 %3544 }
 0x22b   : > { %v3323_v12 = vpack.c.bf16 %v1765_v28, %v1765_v28  ;;  %v3593_v10 = vpack.i.bf16 %v2783_v13, %v2782_v33  ;;  %v2781_v46 = vmax.f32 %v2765_v23, 0.0  ;;  %v3401_v5 = vpop.f32.mrf.mxu0  ;;  %v3546_v28 = vunpack.i.l.bf16 %v3545_v57 }
 0x22c   : > { %v1763_v43 = vsel %vm1762_vm7, %v1024_v16, %v3526_v20  ;;  %v1009_v58 = vadd.f32 %v4769_v0, %v987_v29  ;;  %v992_v24 = vmul.f32 %v3401_v5, %v4758_v59  ;;  %v1027_v17 = vmax.f32 %v1011_v27, 0.0 }
 0x22d   : > { %2996 = vst.msk [vmem:[%s4895_s12 + $0x10] sm:$0xf] %vm340_vm0, %v3323_v12  ;;  %v3319_v40 = vpack.c.bf16 %v1763_v43, %v1763_v43  ;;  %v3588_v37 = vpack.i.bf16 %v2781_v46, %v2780_v2  ;;  %3594 = vrot.lane.b32.xlu1 %v3593_v10, %s3713_s29  ;;  %v933_v18 = vpop.f32.mrf.mxu0 }
 0x22e   : > { %v1025_v32 = vmax.f32 %v1009_v58, 0.0  ;;  %v1014_v50 = vadd.f32 %v4769_v0, %v992_v24  ;;  %v990_v45 = vmul.f32 %v4758_v59, %v933_v18  ;;  %v1766_v36 = vsel %vm1762_vm7, %v1027_v17, %v3522_v30 }
 0x22f   : > { %2992 = vst.msk [vmem:[%s4895_s12] sm:$0xf] %vm340_vm0, %v3319_v40  ;;  %3589 = vrot.lane.b32.xlu0 %v3588_v37, %s3713_s29  ;;  %v3402_v22 = vpop.f32.mrf.mxu0  ;;  %v3324_v7 = vpack.c.bf16 %v1766_v36, %v1766_v36  ;;  %v3542_v58 = vunpack.i.h.bf16 %v3540_v21  ;;  %v3547_v37 = vunpack.i.h.bf16 %v3545_v57 }
 0x230   : > { %v1764_v8 = vsel %vm1762_vm7, %v1025_v32, %v3527_v63  ;;  %v1030_v39 = vmax.f32 %v1014_v50, 0.0  ;;  %v1012_v14 = vadd.f32 %v4769_v0, %v990_v45  ;;  %v993_v11 = vmul.f32 %v3402_v22, %v4758_v59 }
 0x231   : > { %v3320_v51 = vpack.c.bf16 %v1764_v8, %v1764_v8  ;;  %v936_v35 = vpop.f32.mrf.mxu0  ;;  %2997 = vst.msk [vmem:[%s4895_s12 + $0x14] sm:$0xf] %vm340_vm0, %v3324_v7 }
 0x232   : > { %v1769_v52 = vsel %vm1762_vm7, %v1030_v39, %v3531_v15  ;;  %v1028_v56 = vmax.f32 %v1012_v14, 0.0  ;;  %v991_v61 = vmul.f32 %v4758_v59, %v936_v35  ;;  %v1015_v47 = vadd.f32 %v4769_v0, %v993_v11 }
 0x233   : > { %2993 = vst.msk [vmem:[%s4895_s12 + $0x4] sm:$0xf] %vm340_vm0, %v3320_v51  ;;  %v3331_v34 = vpack.c.bf16 %v1769_v52, %v1769_v52  ;;  %v3405_v3 = vpop.f32.mrf.mxu0 }
 0x234   : > { %v1767_v54 = vsel %vm1762_vm7, %v1028_v56, %v3536_v26  ;;  %v1013_v6 = vadd.f32 %v4769_v0, %v991_v61  ;;  %v996_v62 = vmul.f32 %v3405_v3, %v4758_v59  ;;  %v1031_v31 = vmax.f32 %v1015_v47, 0.0 }
 0x235   : > { %3004 = vst.msk [vmem:[%s4895_s12 + $0x30] sm:$0xf] %vm340_vm0, %v3331_v34  ;;  %v3327_v41 = vpack.c.bf16 %v1767_v54, %v1767_v54  ;;  %v949_v42 = vpop.f32.mrf.mxu0 }
 0x236   : > { %v1029_v9 = vmax.f32 %v1013_v6, 0.0  ;;  %v1018_v55 = vadd.f32 %v4769_v0, %v996_v62  ;;  %v994_v53 = vmul.f32 %v4758_v59, %v949_v42  ;;  %v1770_v20 = vsel %vm1762_vm7, %v1031_v31, %v3532_v1 }
 0x237   : > { %3000 = vst.msk [vmem:[%s4895_s12 + $0x20] sm:$0xf] %vm340_vm0, %v3327_v41  ;;  %v3406_v44 = vpop.f32.mrf.mxu0  ;;  %v3332_v60 = vpack.c.bf16 %v1770_v20, %v1770_v20 }
 0x238   : > { %v1768_v33 = vsel %vm1762_vm7, %v1029_v9, %v3537_v48  ;;  %v1034_v13 = vmax.f32 %v1018_v55, 0.0  ;;  %v1016_v23 = vadd.f32 %v4769_v0, %v994_v53  ;;  %v997_v49 = vmul.f32 %v3406_v44, %v4758_v59 }
 0x239   : > { %v3328_v25 = vpack.c.bf16 %v1768_v33, %v1768_v33  ;;  %v952_v2 = vpop.f32.mrf.mxu0  ;;  %3005 = vst.msk [vmem:[%s4895_s12 + $0x34] sm:$0xf] %vm340_vm0, %v3332_v60 }
 0x23a   : > { %v1773_v16 = vsel %vm1762_vm7, %v1034_v13, %v3541_v4  ;;  %v1032_v29 = vmax.f32 %v1016_v23, 0.0  ;;  %v995_v12 = vmul.f32 %v4758_v59, %v952_v2  ;;  %v1019_v46 = vadd.f32 %v4769_v0, %v997_v49 }
 0x23b   : > { %3001 = vst.msk [vmem:[%s4895_s12 + $0x24] sm:$0xf] %vm340_vm0, %v3328_v25  ;;  %v3339_v10 = vpack.c.bf16 %v1773_v16, %v1773_v16  ;;  %v3409_v27 = vpop.f32.mrf.mxu0 }
 0x23c   : > { %v1771_v5 = vsel %vm1762_vm7, %v1032_v29, %v3546_v28  ;;  %v1017_v38 = vadd.f32 %v4769_v0, %v995_v12  ;;  %v1000_v43 = vmul.f32 %v3409_v27, %v4758_v59  ;;  %v1035_v30 = vmax.f32 %v1019_v46, 0.0 }
 0x23d   : > { %3012 = vst.msk [vmem:[%s4895_s12 + $0x50] sm:$0xf] %vm340_vm0, %v3339_v10  ;;  %v3335_v24 = vpack.c.bf16 %v1771_v5, %v1771_v5  ;;  %v965_v40 = vpop.f32.mrf.mxu0 }
 0x23e   : > { %v1033_v17 = vmax.f32 %v1017_v38, 0.0  ;;  %v1022_v18 = vadd.f32 %v4769_v0, %v1000_v43  ;;  %v998_v63 = vmul.f32 %v4758_v59, %v965_v40  ;;  %v1774_v32 = vsel %vm1762_vm7, %v1035_v30, %v3542_v58 }
 0x23f   : > { %3008 = vst.msk [vmem:[%s4895_s12 + $0x40] sm:$0xf] %vm340_vm0, %v3335_v24  ;;  %v3550_v50 = vpop.permute.xlu1 %3549  ;;  %v3410_v45 = vpop.f32.mrf.mxu0  ;;  %v3340_v15 = vpack.c.bf16 %v1774_v32, %v1774_v32 }
 0x240   : > { %v1772_v19 = vsel %vm1762_vm7, %v1033_v17, %v3547_v37  ;;  %v1038_v36 = vmax.f32 %v1022_v18, 0.0  ;;  %v1020_v22 = vadd.f32 %v4769_v0, %v998_v63  ;;  %v3551_v8 = vunpack.i.l.bf16 %v3550_v50 }
 0x241   : > { %v3336_v7 = vpack.c.bf16 %v1772_v19, %v1772_v19  ;;  %v1001_v39 = vmul.f32 %v3410_v45, %v4758_v59  ;;  %v968_v14 = vpop.f32.mrf.mxu0  ;;  %v3555_v51 = vpop.permute.xlu0 %3554  ;;  %3013 = vst.msk [vmem:[%s4895_s12 + $0x54] sm:$0xf] %vm340_vm0, %v3340_v15  ;;  %v3552_v21 = vunpack.i.h.bf16 %v3550_v50 }
 0x242   : > { %v1036_v11 = vmax.f32 %v1020_v22, 0.0  ;;  %v999_v35 = vmul.f32 %v4758_v59, %v968_v14  ;;  %v3556_v26 = vunpack.i.l.bf16 %v3555_v51  ;;  %v1777_v52 = vsel %vm1762_vm7, %v1038_v36, %v3551_v8 }
 0x243   : > { %3009 = vst.msk [vmem:[%s4895_s12 + $0x44] sm:$0xf] %vm340_vm0, %v3336_v7  ;;  %v1023_v56 = vadd.f32 %v4769_v0, %v1001_v39  ;;  %v3347_v61 = vpack.c.bf16 %v1777_v52, %v1777_v52  ;;  %v3437_v3 = vpop.f32.mrf.mxu0  ;;  %v3557_v1 = vunpack.i.h.bf16 %v3555_v51 }
 0x244   : > { %v1021_v34 = vadd.f32 %v4769_v0, %v999_v35  ;;  %v1775_v47 = vsel %vm1762_vm7, %v1036_v11, %v3556_v26  ;;  %v2192_v53 = vmul.f32 %v3437_v3, %v4758_v59 }
 0x245   : > { %v1039_v54 = vmax.f32 %v1023_v56, 0.0  ;;  %v3343_v6 = vpack.c.bf16 %v1775_v47, %v1775_v47  ;;  %3020 = vst.msk [vmem:[%s4895_s12 + $0x70] sm:$0xf] %vm340_vm0, %v3347_v61  ;;  %v2127_v48 = vpop.f32.mrf.mxu0 }
 0x246   : > { %v1037_v62 = vmax.f32 %v1021_v34, 0.0  ;;  %v2208_v20 = vadd.f32 %v4769_v0, %v2192_v53  ;;  %v2190_v60 = vmul.f32 %v4758_v59, %v2127_v48 }
 0x247   : > { %v1778_v41 = vsel %vm1762_vm7, %v1039_v54, %v3552_v21  ;;  %3016 = vst.msk [vmem:[%s4895_s12 + $0x60] sm:$0xf] %vm340_vm0, %v3343_v6  ;;  %v3438_v55 = vpop.f32.mrf.mxu0 }
 0x248   : > { %v3348_v31 = vpack.c.bf16 %v1778_v41, %v1778_v41  ;;  %v1776_v42 = vsel %vm1762_vm7, %v1037_v62, %v3557_v1  ;;  %v2193_v4 = vmul.f32 %v3438_v55, %v4758_v59  ;;  %v2224_v13 = vmax.f32 %v2208_v20, 0.0 }
 0x249   : > { %v3344_v9 = vpack.c.bf16 %v1776_v42, %v1776_v42  ;;  %v2130_v57 = vpop.f32.mrf.mxu0  ;;  %v2206_v49 = vadd.f32 %v4769_v0, %v2190_v60 }
 0x24a   : > { %3021 = vst.msk [vmem:[%s4895_s12 + $0x74] sm:$0xf] %vm340_vm0, %v3348_v31  ;;  %v2191_v44 = vmul.f32 %v4758_v59, %v2130_v57  ;;  %v2209_v33 = vadd.f32 %v4769_v0, %v2193_v4 }
 0x24b   : > { %3017 = vst.msk [vmem:[%s4895_s12 + $0x64] sm:$0xf] %vm340_vm0, %v3344_v9  ;;  %v3441_v12 = vpop.f32.mrf.mxu0  ;;  %v2222_v58 = vmax.f32 %v2206_v49, 0.0 }
 0x24c   : > { %v2207_v23 = vadd.f32 %v4769_v0, %v2191_v44  ;;  %v2225_v2 = vmax.f32 %v2209_v33, 0.0  ;;  %v2196_v50 = vmul.f32 %v3441_v12, %v4758_v59 }
 0x24d   : > { %v2143_v40 = vpop.f32.mrf.mxu0 }
 0x24e   : > { %v2223_v27 = vmax.f32 %v2207_v23, 0.0  ;;  %v2194_v15 = vmul.f32 %v4758_v59, %v2143_v40  ;;  %v2212_v36 = vadd.f32 %v4769_v0, %v2196_v50 }
 0x24f   : > { %v3442_v63 = vpop.f32.mrf.mxu0 }
 0x250   : > { %v2197_v45 = vmul.f32 %v3442_v63, %v4758_v59  ;;  %v2210_v7 = vadd.f32 %v4769_v0, %v2194_v15  ;;  %v2228_v14 = vmax.f32 %v2212_v36, 0.0 }
 0x251   : > { %v2146_v32 = vpop.f32.mrf.mxu0 }
 0x252   : > { %v2195_v19 = vmul.f32 %v4758_v59, %v2146_v32  ;;  %v2213_v22 = vadd.f32 %v4769_v0, %v2197_v45  ;;  %v2226_v26 = vmax.f32 %v2210_v7, 0.0 }
 0x253   : > { %v3445_v61 = vpop.f32.mrf.mxu0 }
 0x254   : > { %v2211_v8 = vadd.f32 %v4769_v0, %v2195_v19  ;;  %v2229_v51 = vmax.f32 %v2213_v22, 0.0  ;;  %v2200_v55 = vmul.f32 %v3445_v61, %v4758_v59 }
 0x255   : > { %v2159_v42 = vpop.f32.mrf.mxu0 }
 0x256   : > { %v2227_v52 = vmax.f32 %v2211_v8, 0.0  ;;  %v2198_v4 = vmul.f32 %v4758_v59, %v2159_v42  ;;  %v2216_v20 = vadd.f32 %v4769_v0, %v2200_v55 }
 0x257   : > { %v3560_v25 = vpop.permute.xlu1 %3559  ;;  %v3446_v48 = vpop.f32.mrf.mxu0 }
 0x258   : > { %v3562_v28 = vunpack.i.h.bf16 %v3560_v25  ;;  %v3561_v16 = vunpack.i.l.bf16 %v3560_v25  ;;  %v2201_v53 = vmul.f32 %v3446_v48, %v4758_v59  ;;  %v2214_v60 = vadd.f32 %v4769_v0, %v2198_v4 }
 0x259   : > { %v3565_v29 = vpop.permute.xlu0 %3564  ;;  %v2162_v9 = vpop.f32.mrf.mxu0  ;;  %v2232_v23 = vmax.f32 %v2216_v20, 0.0 }
 0x25a   : > { %v2850_v10 = vsel %vm1762_vm7, %v2224_v13, %v3561_v16  ;;  %v2851_v46 = vsel %vm1762_vm7, %v2225_v2, %v3562_v28  ;;  %v3567_v43 = vunpack.i.h.bf16 %v3565_v29  ;;  %v3566_v24 = vunpack.i.l.bf16 %v3565_v29 }
 0x25b   : > { %v3325_v5 = vpack.c.bf16 %v2850_v10, %v2850_v10  ;;  %v3326_v38 = vpack.c.bf16 %v2851_v46, %v2851_v46  ;;  %v2199_v57 = vmul.f32 %v4758_v59, %v2162_v9  ;;  %v2217_v44 = vadd.f32 %v4769_v0, %v2201_v53  ;;  %v3449_v12 = vpop.f32.mrf.mxu0 }
 0x25c   : > { %v2849_v30 = vsel %vm1762_vm7, %v2223_v27, %v3567_v43  ;;  %v2848_v17 = vsel %vm1762_vm7, %v2222_v58, %v3566_v24  ;;  %v2230_v28 = vmax.f32 %v2214_v60, 0.0  ;;  %v2204_v63 = vmul.f32 %v3449_v12, %v4758_v59 }
 0x25d   : > { %2998 = vst.msk [vmem:[%s4895_s12 + $0x18] sm:$0xf] %vm340_vm0, %v3325_v5  ;;  %2999 = vst.msk [vmem:[%s4895_s12 + $0x1c] sm:$0xf] %vm340_vm0, %v3326_v38  ;;  %v3322_v37 = vpack.c.bf16 %v2849_v30, %v2849_v30  ;;  %v3321_v18 = vpack.c.bf16 %v2848_v17, %v2848_v17  ;;  %v2215_v33 = vadd.f32 %v4769_v0, %v2199_v57  ;;  %v2233_v25 = vmax.f32 %v2217_v44, 0.0 }
 0x25e   : > { %v2220_v15 = vadd.f32 %v4769_v0, %v2204_v63 }
 0x25f   : > { %2995 = vst.msk [vmem:[%s4895_s12 + $0xc] sm:$0xf] %vm340_vm0, %v3322_v37  ;;  %2994 = vst.msk [vmem:[%s4895_s12 + $0x8] sm:$0xf] %vm340_vm0, %v3321_v18  ;;  %v2231_v16 = vmax.f32 %v2215_v33, 0.0  ;;  %v2175_v37 = vpop.f32.mrf.mxu0 }
 0x260   : > { %v2202_v50 = vmul.f32 %v4758_v59, %v2175_v37  ;;  %v2236_v8 = vmax.f32 %v2220_v15, 0.0 }
 0x261   : > { %v3450_v17 = vpop.f32.mrf.mxu0 }
 0x262   : > { %v2205_v32 = vmul.f32 %v3450_v17, %v4758_v59  ;;  %v2218_v36 = vadd.f32 %v4769_v0, %v2202_v50 }
 0x263   : > { %v2178_v18 = vpop.f32.mrf.mxu0 }
 0x264   : > { %v2203_v45 = vmul.f32 %v4758_v59, %v2178_v18  ;;  %v2221_v19 = vadd.f32 %v4769_v0, %v2205_v32 }
 0x266   : > { %v2219_v22 = vadd.f32 %v4769_v0, %v2203_v45 }
 0x26f   : > { %v3570_v39 = vpop.permute.xlu1 %3569 }
 0x270   : > { %v3572_v11 = vunpack.i.h.bf16 %v3570_v39  ;;  %v3571_v35 = vunpack.i.l.bf16 %v3570_v39  ;;  %v2237_v39 = vmax.f32 %v2221_v19, 0.0 }
 0x271   : > { %v3575_v56 = vpop.permute.xlu0 %3574 }
 0x272   : > { %v2854_v34 = vsel %vm1762_vm7, %v2228_v14, %v3571_v35  ;;  %v2855_v47 = vsel %vm1762_vm7, %v2229_v51, %v3572_v11  ;;  %v3577_v3 = vunpack.i.h.bf16 %v3575_v56  ;;  %v3576_v21 = vunpack.i.l.bf16 %v3575_v56 }
 0x273   : > { %v3333_v54 = vpack.c.bf16 %v2854_v34, %v2854_v34  ;;  %v3334_v6 = vpack.c.bf16 %v2855_v47, %v2855_v47  ;;  %v2234_v11 = vmax.f32 %v2218_v36, 0.0  ;;  %v2235_v35 = vmax.f32 %v2219_v22, 0.0 }
 0x274   : > { %v2853_v62 = vsel %vm1762_vm7, %v2227_v52, %v3577_v3  ;;  %v2852_v1 = vsel %vm1762_vm7, %v2226_v26, %v3576_v21 }
 0x275   : > { %3006 = vst.msk [vmem:[%s4895_s12 + $0x38] sm:$0xf] %vm340_vm0, %v3333_v54  ;;  %3007 = vst.msk [vmem:[%s4895_s12 + $0x3c] sm:$0xf] %vm340_vm0, %v3334_v6  ;;  %v3330_v41 = vpack.c.bf16 %v2853_v62, %v2853_v62  ;;  %v3329_v31 = vpack.c.bf16 %v2852_v1, %v2852_v1 }
 0x277   : > { %3003 = vst.msk [vmem:[%s4895_s12 + $0x2c] sm:$0xf] %vm340_vm0, %v3330_v41  ;;  %3002 = vst.msk [vmem:[%s4895_s12 + $0x28] sm:$0xf] %vm340_vm0, %v3329_v31 }
 0x287   : > { %v3580_v13 = vpop.permute.xlu1 %3579 }
 0x288   : > { %v3582_v49 = vunpack.i.h.bf16 %v3580_v13  ;;  %v3581_v2 = vunpack.i.l.bf16 %v3580_v13 }
 0x289   : > { %v3585_v29 = vpop.permute.xlu0 %3584 }
 0x28a   : > { %v2858_v10 = vsel %vm1762_vm7, %v2232_v23, %v3581_v2  ;;  %v2859_v46 = vsel %vm1762_vm7, %v2233_v25, %v3582_v49  ;;  %v3587_v27 = vunpack.i.h.bf16 %v3585_v29  ;;  %v3586_v5 = vunpack.i.l.bf16 %v3585_v29 }
 0x28b   : > { %v3341_v38 = vpack.c.bf16 %v2858_v10, %v2858_v10  ;;  %v3342_v43 = vpack.c.bf16 %v2859_v46, %v2859_v46 }
 0x28c   : > { %v2857_v58 = vsel %vm1762_vm7, %v2231_v16, %v3587_v27  ;;  %v2856_v24 = vsel %vm1762_vm7, %v2230_v28, %v3586_v5 }
 0x28d   : > { %3014 = vst.msk [vmem:[%s4895_s12 + $0x58] sm:$0xf] %vm340_vm0, %v3341_v38  ;;  %3015 = vst.msk [vmem:[%s4895_s12 + $0x5c] sm:$0xf] %vm340_vm0, %v3342_v43  ;;  %v3338_v30 = vpack.c.bf16 %v2857_v58, %v2857_v58  ;;  %v3337_v40 = vpack.c.bf16 %v2856_v24, %v2856_v24 }
 0x28f   : > { %3011 = vst.msk [vmem:[%s4895_s12 + $0x4c] sm:$0xf] %vm340_vm0, %v3338_v30  ;;  %3010 = vst.msk [vmem:[%s4895_s12 + $0x48] sm:$0xf] %vm340_vm0, %v3337_v40 }
 0x29f   : > { %v3595_v7 = vpop.permute.xlu1 %3594 }
 0x2a0   : > { %v3597_v14 = vunpack.i.h.bf16 %v3595_v7  ;;  %v3596_v51 = vunpack.i.l.bf16 %v3595_v7 }
 0x2a1   : > { %v3590_v59 = vpop.permute.xlu0 %3589 }
 0x2a2   : > { %v2862_v26 = vsel %vm1762_vm7, %v2236_v8, %v3596_v51  ;;  %v2863_v52 = vsel %vm1762_vm7, %v2237_v39, %v3597_v14  ;;  %v3592_v56 = vunpack.i.h.bf16 %v3590_v59  ;;  %v3591_v61 = vunpack.i.l.bf16 %v3590_v59 }
 0x2a3   : > { %v3349_v34 = vpack.c.bf16 %v2862_v26, %v2862_v26  ;;  %v3350_v0 = vpack.c.bf16 %v2863_v52, %v2863_v52 }
 0x2a4   : > { %v2861_v47 = vsel %vm1762_vm7, %v2235_v35, %v3592_v56  ;;  %v2860_v3 = vsel %vm1762_vm7, %v2234_v11, %v3591_v61 }
 0x2a5   : > { %3022 = vst.msk [vmem:[%s4895_s12 + $0x78] sm:$0xf] %vm340_vm0, %v3349_v34  ;;  %3023 = vst.msk [vmem:[%s4895_s12 + $0x7c] sm:$0xf] %vm340_vm0, %v3350_v0  ;;  %v3346_v21 = vpack.c.bf16 %v2861_v47, %v2861_v47  ;;  %v3345_v54 = vpack.c.bf16 %v2860_v3, %v2860_v3 }
 0x2a7   : > { %3019 = vst.msk [vmem:[%s4895_s12 + $0x6c] sm:$0xf] %vm340_vm0, %v3346_v21  ;;  %3018 = vst.msk [vmem:[%s4895_s12 + $0x68] sm:$0xf] %vm340_vm0, %v3345_v54 }
 0x2a8 PF: > { %s15_s22 = sadd.s32 1, %s3708_s22   ;;  %s5181_s18 = smov %s3700_s20 }
 0x2a9   : > { %p12_p9 = scmp.ge.s32.totalorder %s15_s22, 6   ;;  %s5182_s19 = smov %s3704_s21 }
 0x2aa   : > { %s5183_s20 = smov %s5186_s23  ;;  %s5184_s21 = smov %s5190_s24 }
 0x2ab   :  { %14 = sbr.rel (!%p12_p9) target bundleno = 3 (0x3), region = 79 }

</bundles_post_ra>
